<compile_context>
chip_gen: v7x
topology: tpu7x:2x2x1
jax: 0.10.0
libtpu: 0.0.40
codegen_flags: <defaults>
</compile_context>

<pallas_src>
import math

import jax
import jax.numpy as jnp
from jax import lax
from jax.experimental import pallas as pl
from jax.experimental.pallas import tpu as pltpu


def _round_up(x, m):
    return ((x + m - 1) // m) * m


def _vmem_capacity_bytes():
    """Physical VMEM per TensorCore; conservative fallback = v7x's 64 MiB."""
    try:
        info = pltpu.get_tpu_info()
        cap = getattr(info, "vmem_capacity_bytes", None)
        if cap:
            return int(cap)
    except Exception:
        pass
    return 64 * 1024 * 1024


def _choose_time_tile(T, Bp, Xp0, Hp, num_layers, *, x_bytes, out_bytes, w_bytes,
                      act_bytes, p_bytes, budget):
    """Largest time tile TT fitting the VMEM budget; target TT*Bp >= 256 rows
    (fills the 256-row MXU on v6e/v7x; on v5e's 128-row MXU it is just 2 passes)."""
    L = num_layers
    fixed = (Xp0 * Hp + max(L - 1, 0) * Hp * Hp + L * Hp * Hp) * w_bytes  # weights, 1x
    fixed += L * Bp * Hp * 4                   # carried hidden state (f32 scratch)
    fixed += 2 * L * Bp * Hp * 4               # h0 input (double-buffered)
    fixed += 2 * L * Bp * Hp * out_bytes       # final-state output
    fixed += 2 * L * Hp * 4                    # folded bias (f32)
    per_t = Bp * (2 * Xp0 * x_bytes            # x tile (double-buffered)
                  + 2 * Hp * out_bytes         # output tile (double-buffered)
                  + Hp * p_bytes               # hoisted projection scratch
                  + (Hp * act_bytes if L > 1 else 0))  # inter-layer activation tile
    avail = budget - fixed
    tt_cap = max(1, int(avail // per_t)) if avail > per_t else 1
    tt = max(8, -(-256 // Bp))                 # >= 256 MXU rows
    if tt_cap >= 2 * tt:                       # grow toward ~512 rows if VMEM allows
        tt = 2 * tt
    return int(max(1, min(tt, tt_cap, T, 128)))


def _build_fused_kernel(*, T, TT, Bp, n_tiles, num_layers, compute_dtype):
    multi = num_layers > 1
    ragged = (n_tiles * TT) != T
    last_valid = T - (n_tiles - 1) * TT
    unroll = True if TT <= 16 else 8           # partial unroll for long tiles

    def _loop(n_steps, body, init):
        u = True if unroll is True else max(1, min(int(unroll), n_steps))
        return lax.fori_loop(0, n_steps, body, init, unroll=u)

    def kernel(*refs):
        it = iter(refs)
        x_ref = next(it)                          # (TT*Bp, Xp0)  pipelined input tile
        h0_ref = next(it)                         # (L, Bp, Hp)   grid-invariant
        bias_ref = next(it)                       # (L, 1, Hp)    folded bias (f32)
        wih0_hbm = next(it)                       # (Xp0, Hp)     HBM
        wih_r_hbm = next(it) if multi else None   # (L-1, Hp, Hp) HBM
        whh_hbm = next(it)                        # (L, Hp, Hp)   HBM
        out_ref = next(it)                        # (TT*Bp, Hp)   pipelined output tile
        hfin_ref = next(it)                       # (L, Bp, Hp)   final hidden states
        h_scr = next(it)                          # (L, Bp, Hp)   f32 carried hidden
        p_scr = next(it)                          # (TT*Bp, Hp)   hoisted projection
        wih0_scr = next(it)                       # (Xp0, Hp)     single-buffered weights
        whh_scr = next(it)                        # (L, Hp, Hp)
        act_scr = next(it) if multi else None     # (TT*Bp, Hp)   inter-layer acts (tile)
        wih_r_scr = next(it) if multi else None   # (L-1, Hp, Hp)

        i = pl.program_id(0)

        @pl.when(i == 0)
        def _prologue():
            # Loop-invariant weights: HBM -> VMEM exactly once (single-buffered,
            # instead of default double-buffered BlockSpec residency).
            pltpu.sync_copy(wih0_hbm, wih0_scr)
            pltpu.sync_copy(whh_hbm, whh_scr)
            if multi:
                pltpu.sync_copy(wih_r_hbm, wih_r_scr)
                act_scr[...] = jnp.zeros_like(act_scr)
            h_scr[...] = h0_ref[...].astype(jnp.float32)

        # All layers are processed for this time tile before advancing the grid, so
        # inter-layer activations stay in VMEM (no HBM round-trip between layers).
        for l in range(num_layers):
            if l == 0:
                src = x_ref[...].astype(compute_dtype)
                w_in = wih0_scr[...]
            else:
                src = act_scr[...]
                w_in = wih_r_scr[l - 1]

            # Hoisted input projection (one large MXU matmul per tile, bias folded).
            # TODO(synk): double-buffer p_scr and compute tile i+1's projection while
            #             tile i's latency-bound recurrence runs.
            p_scr[...] = (jnp.dot(src, w_in, preferred_element_type=jnp.float32)
                          + bias_ref[l].astype(jnp.float32)).astype(p_scr.dtype)

            whh = whh_scr[l]
            dst_ref = out_ref if l == num_layers - 1 else act_scr

            # TODO(synk): hold W_hh weight-stationary in the MXU across the time loop
            #             (pltpu.matmul_push_rhs / matmul_acc_lhs / matmul_pop).
            def step(t, h, whh=whh, dst_ref=dst_ref):
                row = pl.multiple_of(t * Bp, Bp)
                pre = p_scr[pl.ds(row, Bp), :].astype(jnp.float32) + jnp.dot(
                    h.astype(compute_dtype), whh, preferred_element_type=jnp.float32)
                h_new = jnp.tanh(pre)
                dst_ref[pl.ds(row, Bp), :] = h_new.astype(dst_ref.dtype)
                return h_new

            h_init = h_scr[l]
            if not ragged:
                h_scr[l] = _loop(TT, step, h_init)
            else:
                # Keep the per-step critical path mask-free: full tiles run the plain
                # loop; only the last (ragged) tile runs a shorter, static-length loop.
                @pl.when(i < n_tiles - 1)
                def _full_tile():
                    h_scr[l] = _loop(TT, step, h_init)

                @pl.when(i == n_tiles - 1)
                def _last_tile():
                    h_scr[l] = _loop(last_valid, step, h_init)

        @pl.when(i == n_tiles - 1)
        def _epilogue():
            hfin_ref[...] = h_scr[...].astype(hfin_ref.dtype)

    return kernel


def _rnn_forward(x2d, h0_p, bias, wih0_t, wih_rest_t, whh_t, *,
                 T, TT, Bp, n_tiles, num_layers, compute_dtype,
                 out_dtype, fin_dtype, vmem_limit_bytes):
    rows, Xp0 = x2d.shape
    Hp = whh_t.shape[-1]
    multi = num_layers > 1
    cdt = jnp.dtype(compute_dtype)
    p_dtype = jnp.float32 if cdt == jnp.dtype(jnp.float32) else cdt

    kernel = _build_fused_kernel(T=T, TT=TT, Bp=Bp, n_tiles=n_tiles,
                                 num_layers=num_layers, compute_dtype=cdt)

    in_specs = [
        pl.BlockSpec((TT * Bp, Xp0), lambda i: (i, 0)),            # x time tile
        pl.BlockSpec((num_layers, Bp, Hp), lambda i: (0, 0, 0)),   # h0 (grid-invariant)
        pl.BlockSpec((num_layers, 1, Hp), lambda i: (0, 0, 0)),    # folded bias
        pl.BlockSpec(memory_space=pl.ANY),                         # W_ih^T layer 0 (HBM)
    ]
    inputs = [x2d, h0_p, bias, wih0_t]
    if multi:
        in_specs.append(pl.BlockSpec(memory_space=pl.ANY))         # W_ih^T layers 1.. (HBM)
        inputs.append(wih_rest_t)
    in_specs.append(pl.BlockSpec(memory_space=pl.ANY))             # W_hh^T all layers (HBM)
    inputs.append(whh_t)

    scratch_shapes = [
        pltpu.VMEM((num_layers, Bp, Hp), jnp.float32),   # carried hidden state (f32)
        pltpu.VMEM((TT * Bp, Hp), p_dtype),              # hoisted projection tile
        pltpu.VMEM((Xp0, Hp), wih0_t.dtype),             # W_ih^T layer 0 (1x buffered)
        pltpu.VMEM((num_layers, Hp, Hp), whh_t.dtype),   # W_hh^T (1x buffered)
    ]
    if multi:
        scratch_shapes += [
            pltpu.VMEM((TT * Bp, Hp), cdt),                          # inter-layer acts
            pltpu.VMEM((num_layers - 1, Hp, Hp), wih_rest_t.dtype),  # W_ih^T layers 1..
        ]

    out2d, hfin = pl.pallas_call(
        kernel,
        out_shape=(jax.ShapeDtypeStruct((rows, Hp), out_dtype),
                   jax.ShapeDtypeStruct((num_layers, Bp, Hp), fin_dtype)),
        grid_spec=pltpu.PrefetchScalarGridSpec(
            num_scalar_prefetch=0,
            grid=(n_tiles,),
            in_specs=in_specs,
            out_specs=[
                pl.BlockSpec((TT * Bp, Hp), lambda i: (i, 0)),       # per-step outputs
                pl.BlockSpec((num_layers, Bp, Hp), lambda i: (0, 0, 0)),  # final hidden
            ],
            scratch_shapes=scratch_shapes,
        ),
        compiler_params=pltpu.CompilerParams(
            dimension_semantics=("arbitrary",),      # time recurrence is sequential
            vmem_limit_bytes=int(vmem_limit_bytes),
        ),
    )(*inputs)
    return out2d, hfin


class UniRNN:
    """Pallas/JAX port of the PyTorch UniRNN module (nn.RNN, tanh, uni-directional).

    compute_dtype (optional, e.g. jnp.bfloat16 for v6e/v7x MXU peak): dtype of the
    MXU operands / weights / inter-layer activations. The carried hidden state and
    all matmul accumulation stay in f32 (documented precision trade-off vs. PyTorch's
    all-f32 recurrence). Default keeps everything in the parameter dtype.
    """

    def __init__(self, xt_size, ht_size, num_layers, key=None,
                 dtype=jnp.float32, compute_dtype=None, time_tile=None):
        if key is None:
            key = jax.random.PRNGKey(0)
        self.xt_size = xt_size
        self.ht_size = ht_size
        self.num_layers = num_layers
        self.dtype = jnp.dtype(dtype)
        self.compute_dtype = (jnp.dtype(compute_dtype) if compute_dtype is not None
                              else jnp.dtype(dtype))
        self.time_tile = time_tile

        # Same uniform init range as PyTorch: U(-1/sqrt(H), 1/sqrt(H)).
        bound = 1.0 / math.sqrt(ht_size)
        self.params = []
        for layer in range(num_layers):
            in_size = xt_size if layer == 0 else ht_size
            key, k1, k2, k3, k4 = jax.random.split(key, 5)
            w_ih = jax.random.uniform(k1, (ht_size, in_size), dtype, -bound, bound)
            w_hh = jax.random.uniform(k2, (ht_size, ht_size), dtype, -bound, bound)
            b_ih = jax.random.uniform(k3, (ht_size,), dtype, -bound, bound)
            b_hh = jax.random.uniform(k4, (ht_size,), dtype, -bound, bound)
            self.params.append((w_ih, w_hh, b_ih, b_hh))

        # Pre-transposed, zero-padded (lane-dense) kernel weights in compute dtype;
        # biases folded (b_ih + b_hh), kept in f32. Padded hidden lanes are zero so
        # they stay exactly zero through the recurrence.
        H = ht_size
        self._Hp = Hp = _round_up(ht_size, 128)
        self._Xp0 = Xp0 = _round_up(xt_size, 128)
        cdt = self.compute_dtype
        w_ih0 = self.params[0][0]
        self._wih0_t = (jnp.zeros((Xp0, Hp), cdt)
                        .at[:xt_size, :H].set(w_ih0.T.astype(cdt)))
        whh_l, bias_l, wrest_l = [], [], []
        for layer, (w_ih, w_hh, b_ih, b_hh) in enumerate(self.params):
            whh_l.append(jnp.zeros((Hp, Hp), cdt).at[:H, :H].set(w_hh.T.astype(cdt)))
            bias_l.append(jnp.zeros((1, Hp), jnp.float32)
                          .at[0, :H].set((b_ih + b_hh).astype(jnp.float32)))
            if layer > 0:
                wrest_l.append(jnp.zeros((Hp, Hp), cdt)
                               .at[:H, :H].set(w_ih.T.astype(cdt)))
        self._whh_t = jnp.stack(whh_l, axis=0)                  # (L, Hp, Hp)
        self._bias = jnp.stack(bias_l, axis=0)                  # (L, 1, Hp)
        self._wih_rest_t = (jnp.stack(wrest_l, axis=0)          # (L-1, Hp, Hp)
                            if num_layers > 1 else None)

    def __call__(self, a_batch_of_seqs, initial_state):
        x = a_batch_of_seqs
        T, B, X = x.shape
        H, L = self.ht_size, self.num_layers
        Hp, Xp0 = self._Hp, self._Xp0
        Bp = _round_up(B, 8)
        cdt = self.compute_dtype

        # Generation-aware VMEM ceiling (~100 MiB on 128 MiB v5e/v6e, ~51 MiB on v7x)
        # and a time tile sized against it.
        cap = _vmem_capacity_bytes()
        vmem_limit = min(int(cap * 0.8), 100 * 1024 * 1024)
        if self.time_tile is not None:
            TT = max(1, min(int(self.time_tile), T))
        else:
            TT = _choose_time_tile(
                T, Bp, Xp0, Hp, L,
                x_bytes=x.dtype.itemsize, out_bytes=x.dtype.itemsize,
                w_bytes=cdt.itemsize, act_bytes=cdt.itemsize,
                p_bytes=(4 if cdt == jnp.dtype(jnp.float32) else cdt.itemsize),
                budget=vmem_limit - (2 << 20))
        Tp = _round_up(T, TT)
        n_tiles = Tp // TT

        # Pad once; (time, batch) flattened into sublane-dense rows. Padded batch rows
        # pick up tanh(bias) values but are independent of valid rows and sliced away.
        x_p = jnp.zeros((Tp, Bp, Xp0), x.dtype).at[:T, :B, :X].set(x)
        x2d = x_p.reshape(Tp * Bp, Xp0)
        h0_p = (jnp.zeros((L, Bp, Hp), initial_state.dtype)
                .at[:, :B, :H].set(initial_state))

        out2d, hfin = _rnn_forward(
            x2d, h0_p, self._bias, self._wih0_t, self._wih_rest_t, self._whh_t,
            T=T, TT=TT, Bp=Bp, n_tiles=n_tiles, num_layers=L,
            compute_dtype=cdt, out_dtype=x.dtype, fin_dtype=initial_state.dtype,
            vmem_limit_bytes=vmem_limit)

        output = out2d.reshape(Tp, Bp, Hp)[:T, :B, :H]
        final_state = hfin[:, :B, :H]
        return output, final_state


def _reference_forward(model, x, h0):
    """Pure-JAX reference (same math) for a correctness check."""
    out = x
    finals = []
    for layer, (w_ih, w_hh, b_ih, b_hh) in enumerate(model.params):
        T, B, _ = out.shape
        h = h0[layer]
        ys = []
        for t in range(T):
            h = jnp.tanh(out[t] @ w_ih.T + b_ih + h @ w_hh.T + b_hh)
            ys.append(h)
        out = jnp.stack(ys, axis=0)
        finals.append(h)
    return out, jnp.stack(finals, axis=0)


if __name__ == "__main__":
    xt_size, ht_size, num_layers = 16, 32, 2
    T, B = 8, 4

    key = jax.random.PRNGKey(0)
    k_x, k_h, k_p, k_x2, k_h2 = jax.random.split(key, 5)
    x = jax.random.normal(k_x, (T, B, xt_size), jnp.float32)
    h0 = jax.random.normal(k_h, (num_layers, B, ht_size), jnp.float32)

    # 1) f32, auto time tile (single tile).
    model = UniRNN(xt_size, ht_size, num_layers, key=k_p)
    output, final_state = model(x, h0)
    output = jax.block_until_ready(output)
    final_state = jax.block_until_ready(final_state)
    ref_out, ref_fin = _reference_forward(model, x, h0)
    assert output.shape == (T, B, ht_size)
    assert final_state.shape == (num_layers, B, ht_size)
    assert jnp.allclose(output, ref_out, atol=1e-5, rtol=1e-5)
    assert jnp.allclose(final_state, ref_fin, atol=1e-5, rtol=1e-5)

    # 2) Ragged / multi-time-tile path (T not a multiple of the time tile) + odd batch.
    T2, B2 = 40, 3
    x2 = jax.random.normal(k_x2, (T2, B2, xt_size), jnp.float32)
    h02 = jax.random.normal(k_h2, (num_layers, B2, ht_size), jnp.float32)
    model_rag = UniRNN(xt_size, ht_size, num_layers, key=k_p, time_tile=16)
    out2, fin2 = model_rag(x2, h02)
    out2 = jax.block_until_ready(out2)
    ref_out2, ref_fin2 = _reference_forward(model_rag, x2, h02)
    assert jnp.allclose(out2, ref_out2, atol=1e-5, rtol=1e-5)
    assert jnp.allclose(fin2, ref_fin2, atol=1e-5, rtol=1e-5)

    # 3) Opt-in bf16 MXU-operand path (f32 carried state / accumulation), loose check.
    model_bf16 = UniRNN(xt_size, ht_size, num_layers, key=k_p,
                        compute_dtype=jnp.bfloat16)
    out_bf, fin_bf = model_bf16(x, h0)
    out_bf = jax.block_until_ready(out_bf)
    assert out_bf.dtype == x.dtype
    assert float(jnp.max(jnp.abs(out_bf - ref_out))) < 0.1
    assert float(jnp.max(jnp.abs(fin_bf - ref_fin))) < 0.1

    print("KERNEL_OK")
</pallas_src>

<mosaic_0001>
module attributes {stable_mosaic.version = 11 : i64} {
  func.func @kernel(%arg0: i32, %arg1: memref<64x128xf32, #tpu.memory_space<vmem>>, %arg2: memref<2x8x128xf32, #tpu.memory_space<vmem>>, %arg3: memref<2x1x128xf32, #tpu.memory_space<vmem>>, %arg4: memref<128x128xf32, #tpu.memory_space<any>>, %arg5: memref<1x128x128xf32, #tpu.memory_space<any>>, %arg6: memref<2x128x128xf32, #tpu.memory_space<any>>, %arg7: memref<64x128xf32, #tpu.memory_space<vmem>>, %arg8: memref<2x8x128xf32, #tpu.memory_space<vmem>>, %arg9: memref<2x8x128xf32, #tpu.memory_space<vmem>>, %arg10: memref<64x128xf32, #tpu.memory_space<vmem>>, %arg11: memref<128x128xf32, #tpu.memory_space<vmem>>, %arg12: memref<2x128x128xf32, #tpu.memory_space<vmem>>, %arg13: memref<64x128xf32, #tpu.memory_space<vmem>>, %arg14: memref<1x128x128xf32, #tpu.memory_space<vmem>>) attributes {dimension_semantics = [#tpu.dimension_semantics<arbitrary>], iteration_bounds = array<i64: 1>, scalar_prefetch = 0 : i64, scratch_operands = 6 : i64, tpu.core_type = #tpu.core_type<tc>, window_params = [{transform_indices = @transform_0, window_bounds = array<i64: 64, 128>}, {pipeline_mode = #tpu.pipeline_mode<synchronous>, transform_indices = @transform_1, window_bounds = array<i64: 2, 8, 128>}, {pipeline_mode = #tpu.pipeline_mode<synchronous>, transform_indices = @transform_2, window_bounds = array<i64: 2, 1, 128>}, {}, {}, {}, {transform_indices = @transform_6, window_bounds = array<i64: 64, 128>}, {pipeline_mode = #tpu.pipeline_mode<synchronous>, transform_indices = @transform_7, window_bounds = array<i64: 2, 8, 128>}]} {
    %c0_i32 = arith.constant 0 : i32
    %0 = arith.cmpi eq, %arg0, %c0_i32 : i32
    %1 = arith.extui %0 : i1 to i32
    %c0_i32_0 = arith.constant 0 : i32
    %2 = arith.cmpi ne, %1, %c0_i32_0 : i32
    scf.if %2 {
      "tpu.region"() ({
        %185 = tpu.sem_alloc : memref<!tpu.dma_semaphore, #tpu.memory_space<semaphore_mem>>
        tpu.enqueue_dma source(%arg4 : memref<128x128xf32, #tpu.memory_space<any>>) target(%arg11 : memref<128x128xf32, #tpu.memory_space<vmem>>) target_semaphore(%185 : memref<!tpu.dma_semaphore, #tpu.memory_space<semaphore_mem>>)
        tpu.wait_dma2 semaphore(%185 : memref<!tpu.dma_semaphore, #tpu.memory_space<semaphore_mem>>) src(%arg4 : memref<128x128xf32, #tpu.memory_space<any>>) dst(%arg11 : memref<128x128xf32, #tpu.memory_space<vmem>>)
        tpu.yield
      }) : () -> ()
      "tpu.region"() ({
        %185 = tpu.sem_alloc : memref<!tpu.dma_semaphore, #tpu.memory_space<semaphore_mem>>
        tpu.enqueue_dma source(%arg6 : memref<2x128x128xf32, #tpu.memory_space<any>>) target(%arg12 : memref<2x128x128xf32, #tpu.memory_space<vmem>>) target_semaphore(%185 : memref<!tpu.dma_semaphore, #tpu.memory_space<semaphore_mem>>)
        tpu.wait_dma2 semaphore(%185 : memref<!tpu.dma_semaphore, #tpu.memory_space<semaphore_mem>>) src(%arg6 : memref<2x128x128xf32, #tpu.memory_space<any>>) dst(%arg12 : memref<2x128x128xf32, #tpu.memory_space<vmem>>)
        tpu.yield
      }) : () -> ()
      "tpu.region"() ({
        %185 = tpu.sem_alloc : memref<!tpu.dma_semaphore, #tpu.memory_space<semaphore_mem>>
        tpu.enqueue_dma source(%arg5 : memref<1x128x128xf32, #tpu.memory_space<any>>) target(%arg14 : memref<1x128x128xf32, #tpu.memory_space<vmem>>) target_semaphore(%185 : memref<!tpu.dma_semaphore, #tpu.memory_space<semaphore_mem>>)
        tpu.wait_dma2 semaphore(%185 : memref<!tpu.dma_semaphore, #tpu.memory_space<semaphore_mem>>) src(%arg5 : memref<1x128x128xf32, #tpu.memory_space<any>>) dst(%arg14 : memref<1x128x128xf32, #tpu.memory_space<vmem>>)
        tpu.yield
      }) : () -> ()
      %cst_113 = arith.constant 0.000000e+00 : f32
      %181 = vector.broadcast %cst_113 : f32 to vector<64x128xf32>
      %c0_114 = arith.constant 0 : index
      %c0_115 = arith.constant 0 : index
      %182 = vector.load %arg13[%c0_114, %c0_115] : memref<64x128xf32, #tpu.memory_space<vmem>>, vector<64x128xf32>
      tpu.vector_store %arg13[%c0_114, %c0_115], %181 {strides = array<i32>} : memref<64x128xf32, #tpu.memory_space<vmem>>, vector<64x128xf32>,
      %c0_116 = arith.constant 0 : index
      %c0_117 = arith.constant 0 : index
      %c0_118 = arith.constant 0 : index
      %183 = vector.load %arg2[%c0_116, %c0_117, %c0_118] : memref<2x8x128xf32, #tpu.memory_space<vmem>>, vector<2x8x128xf32>
      %c0_119 = arith.constant 0 : index
      %c0_120 = arith.constant 0 : index
      %c0_121 = arith.constant 0 : index
      %184 = vector.load %arg9[%c0_119, %c0_120, %c0_121] : memref<2x8x128xf32, #tpu.memory_space<vmem>>, vector<2x8x128xf32>
      tpu.vector_store %arg9[%c0_119, %c0_120, %c0_121], %183 {strides = array<i32>} : memref<2x8x128xf32, #tpu.memory_space<vmem>>, vector<2x8x128xf32>,
    } else {
    }
    %c0 = arith.constant 0 : index
    %c0_1 = arith.constant 0 : index
    %3 = vector.load %arg1[%c0, %c0_1] : memref<64x128xf32, #tpu.memory_space<vmem>>, vector<64x128xf32>
    %c0_2 = arith.constant 0 : index
    %c0_3 = arith.constant 0 : index
    %4 = vector.load %arg11[%c0_2, %c0_3] : memref<128x128xf32, #tpu.memory_space<vmem>>, vector<128x128xf32>
    %cst = arith.constant dense<0.000000e+00> : vector<64x128xf32>
    %5 = tpu.matmul %3, %4, %cst {dimension_numbers = #tpu.dot_dimension_numbers<[1], [0], [0], [1], [0, 0, 1, 1], [], []>} : vector<64x128xf32>, vector<128x128xf32>, vector<64x128xf32> -> vector<64x128xf32>
    %c0_4 = arith.constant 0 : index
    %c0_5 = arith.constant 0 : index
    %c0_6 = arith.constant 0 : index
    %6 = vector.load %arg3[%c0_4, %c0_5, %c0_6] : memref<2x1x128xf32, #tpu.memory_space<vmem>>, vector<1x1x128xf32>
    %7 = vector.shape_cast %6 : vector<1x1x128xf32> to vector<1x128xf32>
    %8 = vector.broadcast %7 : vector<1x128xf32> to vector<64x128xf32>
    %9 = arith.addf %5, %8 : vector<64x128xf32>
    %c0_7 = arith.constant 0 : index
    %c0_8 = arith.constant 0 : index
    %10 = vector.load %arg10[%c0_7, %c0_8] : memref<64x128xf32, #tpu.memory_space<vmem>>, vector<64x128xf32>
    tpu.vector_store %arg10[%c0_7, %c0_8], %9 {strides = array<i32>} : memref<64x128xf32, #tpu.memory_space<vmem>>, vector<64x128xf32>,
    %c0_9 = arith.constant 0 : index
    %c0_10 = arith.constant 0 : index
    %c0_11 = arith.constant 0 : index
    %11 = vector.load %arg12[%c0_9, %c0_10, %c0_11] : memref<2x128x128xf32, #tpu.memory_space<vmem>>, vector<1x128x128xf32>
    %12 = vector.shape_cast %11 : vector<1x128x128xf32> to vector<128x128xf32>
    %c0_12 = arith.constant 0 : index
    %c0_13 = arith.constant 0 : index
    %c0_14 = arith.constant 0 : index
    %13 = vector.load %arg9[%c0_12, %c0_13, %c0_14] : memref<2x8x128xf32, #tpu.memory_space<vmem>>, vector<1x8x128xf32>
    %14 = vector.shape_cast %13 : vector<1x8x128xf32> to vector<8x128xf32>
    %c0_i32_15 = arith.constant 0 : i32
    %c8_i32 = arith.constant 8 : i32
    %15 = arith.muli %c0_i32_15, %c8_i32 : i32
    %16 = tpu.assume_multiple %15, 8 : i32
    %17 = arith.index_cast %16 : i32 to index
    %c0_16 = arith.constant 0 : index
    %18 = vector.load %arg10[%17, %c0_16] : memref<64x128xf32, #tpu.memory_space<vmem>>, vector<8x128xf32>
    %cst_17 = arith.constant dense<0.000000e+00> : vector<8x128xf32>
    %19 = tpu.matmul %14, %12, %cst_17 {dimension_numbers = #tpu.dot_dimension_numbers<[1], [0], [0], [1], [0, 0, 1, 1], [], []>} : vector<8x128xf32>, vector<128x128xf32>, vector<8x128xf32> -> vector<8x128xf32>
    %20 = arith.addf %18, %19 : vector<8x128xf32>
    %21 = math.tanh %20 : vector<8x128xf32>
    %22 = arith.index_cast %16 : i32 to index
    %c0_18 = arith.constant 0 : index
    %23 = vector.load %arg13[%22, %c0_18] : memref<64x128xf32, #tpu.memory_space<vmem>>, vector<8x128xf32>
    tpu.vector_store %arg13[%22, %c0_18], %21 {strides = array<i32>} : memref<64x128xf32, #tpu.memory_space<vmem>>, vector<8x128xf32>,
    %c1_i32 = arith.constant 1 : i32
    %c8_i32_19 = arith.constant 8 : i32
    %24 = arith.muli %c1_i32, %c8_i32_19 : i32
    %25 = tpu.assume_multiple %24, 8 : i32
    %26 = arith.index_cast %25 : i32 to index
    %c0_20 = arith.constant 0 : index
    %27 = vector.load %arg10[%26, %c0_20] : memref<64x128xf32, #tpu.memory_space<vmem>>, vector<8x128xf32>
    %cst_21 = arith.constant dense<0.000000e+00> : vector<8x128xf32>
    %28 = tpu.matmul %21, %12, %cst_21 {dimension_numbers = #tpu.dot_dimension_numbers<[1], [0], [0], [1], [0, 0, 1, 1], [], []>} : vector<8x128xf32>, vector<128x128xf32>, vector<8x128xf32> -> vector<8x128xf32>
    %29 = arith.addf %27, %28 : vector<8x128xf32>
    %30 = math.tanh %29 : vector<8x128xf32>
    %31 = arith.index_cast %25 : i32 to index
    %c0_22 = arith.constant 0 : index
    %32 = vector.load %arg13[%31, %c0_22] : memref<64x128xf32, #tpu.memory_space<vmem>>, vector<8x128xf32>
    tpu.vector_store %arg13[%31, %c0_22], %30 {strides = array<i32>} : memref<64x128xf32, #tpu.memory_space<vmem>>, vector<8x128xf32>,
    %c2_i32 = arith.constant 2 : i32
    %c8_i32_23 = arith.constant 8 : i32
    %33 = arith.muli %c2_i32, %c8_i32_23 : i32
    %34 = tpu.assume_multiple %33, 8 : i32
    %35 = arith.index_cast %34 : i32 to index
    %c0_24 = arith.constant 0 : index
    %36 = vector.load %arg10[%35, %c0_24] : memref<64x128xf32, #tpu.memory_space<vmem>>, vector<8x128xf32>
    %cst_25 = arith.constant dense<0.000000e+00> : vector<8x128xf32>
    %37 = tpu.matmul %30, %12, %cst_25 {dimension_numbers = #tpu.dot_dimension_numbers<[1], [0], [0], [1], [0, 0, 1, 1], [], []>} : vector<8x128xf32>, vector<128x128xf32>, vector<8x128xf32> -> vector<8x128xf32>
    %38 = arith.addf %36, %37 : vector<8x128xf32>
    %39 = math.tanh %38 : vector<8x128xf32>
    %40 = arith.index_cast %34 : i32 to index
    %c0_26 = arith.constant 0 : index
    %41 = vector.load %arg13[%40, %c0_26] : memref<64x128xf32, #tpu.memory_space<vmem>>, vector<8x128xf32>
    tpu.vector_store %arg13[%40, %c0_26], %39 {strides = array<i32>} : memref<64x128xf32, #tpu.memory_space<vmem>>, vector<8x128xf32>,
    %c3_i32 = arith.constant 3 : i32
    %c8_i32_27 = arith.constant 8 : i32
    %42 = arith.muli %c3_i32, %c8_i32_27 : i32
    %43 = tpu.assume_multiple %42, 8 : i32
    %44 = arith.index_cast %43 : i32 to index
    %c0_28 = arith.constant 0 : index
    %45 = vector.load %arg10[%44, %c0_28] : memref<64x128xf32, #tpu.memory_space<vmem>>, vector<8x128xf32>
    %cst_29 = arith.constant dense<0.000000e+00> : vector<8x128xf32>
    %46 = tpu.matmul %39, %12, %cst_29 {dimension_numbers = #tpu.dot_dimension_numbers<[1], [0], [0], [1], [0, 0, 1, 1], [], []>} : vector<8x128xf32>, vector<128x128xf32>, vector<8x128xf32> -> vector<8x128xf32>
    %47 = arith.addf %45, %46 : vector<8x128xf32>
    %48 = math.tanh %47 : vector<8x128xf32>
    %49 = arith.index_cast %43 : i32 to index
    %c0_30 = arith.constant 0 : index
    %50 = vector.load %arg13[%49, %c0_30] : memref<64x128xf32, #tpu.memory_space<vmem>>, vector<8x128xf32>
    tpu.vector_store %arg13[%49, %c0_30], %48 {strides = array<i32>} : memref<64x128xf32, #tpu.memory_space<vmem>>, vector<8x128xf32>,
    %c4_i32 = arith.constant 4 : i32
    %c8_i32_31 = arith.constant 8 : i32
    %51 = arith.muli %c4_i32, %c8_i32_31 : i32
    %52 = tpu.assume_multiple %51, 8 : i32
    %53 = arith.index_cast %52 : i32 to index
    %c0_32 = arith.constant 0 : index
    %54 = vector.load %arg10[%53, %c0_32] : memref<64x128xf32, #tpu.memory_space<vmem>>, vector<8x128xf32>
    %cst_33 = arith.constant dense<0.000000e+00> : vector<8x128xf32>
    %55 = tpu.matmul %48, %12, %cst_33 {dimension_numbers = #tpu.dot_dimension_numbers<[1], [0], [0], [1], [0, 0, 1, 1], [], []>} : vector<8x128xf32>, vector<128x128xf32>, vector<8x128xf32> -> vector<8x128xf32>
    %56 = arith.addf %54, %55 : vector<8x128xf32>
    %57 = math.tanh %56 : vector<8x128xf32>
    %58 = arith.index_cast %52 : i32 to index
    %c0_34 = arith.constant 0 : index
    %59 = vector.load %arg13[%58, %c0_34] : memref<64x128xf32, #tpu.memory_space<vmem>>, vector<8x128xf32>
    tpu.vector_store %arg13[%58, %c0_34], %57 {strides = array<i32>} : memref<64x128xf32, #tpu.memory_space<vmem>>, vector<8x128xf32>,
    %c5_i32 = arith.constant 5 : i32
    %c8_i32_35 = arith.constant 8 : i32
    %60 = arith.muli %c5_i32, %c8_i32_35 : i32
    %61 = tpu.assume_multiple %60, 8 : i32
    %62 = arith.index_cast %61 : i32 to index
    %c0_36 = arith.constant 0 : index
    %63 = vector.load %arg10[%62, %c0_36] : memref<64x128xf32, #tpu.memory_space<vmem>>, vector<8x128xf32>
    %cst_37 = arith.constant dense<0.000000e+00> : vector<8x128xf32>
    %64 = tpu.matmul %57, %12, %cst_37 {dimension_numbers = #tpu.dot_dimension_numbers<[1], [0], [0], [1], [0, 0, 1, 1], [], []>} : vector<8x128xf32>, vector<128x128xf32>, vector<8x128xf32> -> vector<8x128xf32>
    %65 = arith.addf %63, %64 : vector<8x128xf32>
    %66 = math.tanh %65 : vector<8x128xf32>
    %67 = arith.index_cast %61 : i32 to index
    %c0_38 = arith.constant 0 : index
    %68 = vector.load %arg13[%67, %c0_38] : memref<64x128xf32, #tpu.memory_space<vmem>>, vector<8x128xf32>
    tpu.vector_store %arg13[%67, %c0_38], %66 {strides = array<i32>} : memref<64x128xf32, #tpu.memory_space<vmem>>, vector<8x128xf32>,
    %c6_i32 = arith.constant 6 : i32
    %c8_i32_39 = arith.constant 8 : i32
    %69 = arith.muli %c6_i32, %c8_i32_39 : i32
    %70 = tpu.assume_multiple %69, 8 : i32
    %71 = arith.index_cast %70 : i32 to index
    %c0_40 = arith.constant 0 : index
    %72 = vector.load %arg10[%71, %c0_40] : memref<64x128xf32, #tpu.memory_space<vmem>>, vector<8x128xf32>
    %cst_41 = arith.constant dense<0.000000e+00> : vector<8x128xf32>
    %73 = tpu.matmul %66, %12, %cst_41 {dimension_numbers = #tpu.dot_dimension_numbers<[1], [0], [0], [1], [0, 0, 1, 1], [], []>} : vector<8x128xf32>, vector<128x128xf32>, vector<8x128xf32> -> vector<8x128xf32>
    %74 = arith.addf %72, %73 : vector<8x128xf32>
    %75 = math.tanh %74 : vector<8x128xf32>
    %76 = arith.index_cast %70 : i32 to index
    %c0_42 = arith.constant 0 : index
    %77 = vector.load %arg13[%76, %c0_42] : memref<64x128xf32, #tpu.memory_space<vmem>>, vector<8x128xf32>
    tpu.vector_store %arg13[%76, %c0_42], %75 {strides = array<i32>} : memref<64x128xf32, #tpu.memory_space<vmem>>, vector<8x128xf32>,
    %c7_i32 = arith.constant 7 : i32
    %c8_i32_43 = arith.constant 8 : i32
    %78 = arith.muli %c7_i32, %c8_i32_43 : i32
    %79 = tpu.assume_multiple %78, 8 : i32
    %80 = arith.index_cast %79 : i32 to index
    %c0_44 = arith.constant 0 : index
    %81 = vector.load %arg10[%80, %c0_44] : memref<64x128xf32, #tpu.memory_space<vmem>>, vector<8x128xf32>
    %cst_45 = arith.constant dense<0.000000e+00> : vector<8x128xf32>
    %82 = tpu.matmul %75, %12, %cst_45 {dimension_numbers = #tpu.dot_dimension_numbers<[1], [0], [0], [1], [0, 0, 1, 1], [], []>} : vector<8x128xf32>, vector<128x128xf32>, vector<8x128xf32> -> vector<8x128xf32>
    %83 = arith.addf %81, %82 : vector<8x128xf32>
    %84 = math.tanh %83 : vector<8x128xf32>
    %85 = arith.index_cast %79 : i32 to index
    %c0_46 = arith.constant 0 : index
    %86 = vector.load %arg13[%85, %c0_46] : memref<64x128xf32, #tpu.memory_space<vmem>>, vector<8x128xf32>
    tpu.vector_store %arg13[%85, %c0_46], %84 {strides = array<i32>} : memref<64x128xf32, #tpu.memory_space<vmem>>, vector<8x128xf32>,
    %c8_i32_47 = arith.constant 8 : i32
    %c0_48 = arith.constant 0 : index
    %c0_49 = arith.constant 0 : index
    %c0_50 = arith.constant 0 : index
    %87 = vector.load %arg9[%c0_48, %c0_49, %c0_50] : memref<2x8x128xf32, #tpu.memory_space<vmem>>, vector<1x8x128xf32>
    %88 = vector.shape_cast %87 : vector<1x8x128xf32> to vector<8x128xf32>
    %89 = vector.shape_cast %84 : vector<8x128xf32> to vector<1x8x128xf32>
    tpu.vector_store %arg9[%c0_48, %c0_49, %c0_50], %89 {strides = array<i32>} : memref<2x8x128xf32, #tpu.memory_space<vmem>>, vector<1x8x128xf32>,
    %c0_51 = arith.constant 0 : index
    %c0_52 = arith.constant 0 : index
    %90 = vector.load %arg13[%c0_51, %c0_52] : memref<64x128xf32, #tpu.memory_space<vmem>>, vector<64x128xf32>
    %c0_53 = arith.constant 0 : index
    %c0_54 = arith.constant 0 : index
    %c0_55 = arith.constant 0 : index
    %91 = vector.load %arg14[%c0_53, %c0_54, %c0_55] : memref<1x128x128xf32, #tpu.memory_space<vmem>>, vector<1x128x128xf32>
    %92 = vector.shape_cast %91 : vector<1x128x128xf32> to vector<128x128xf32>
    %cst_56 = arith.constant dense<0.000000e+00> : vector<64x128xf32>
    %93 = tpu.matmul %90, %92, %cst_56 {dimension_numbers = #tpu.dot_dimension_numbers<[1], [0], [0], [1], [0, 0, 1, 1], [], []>} : vector<64x128xf32>, vector<128x128xf32>, vector<64x128xf32> -> vector<64x128xf32>
    %c1 = arith.constant 1 : index
    %c0_57 = arith.constant 0 : index
    %c0_58 = arith.constant 0 : index
    %94 = vector.load %arg3[%c1, %c0_57, %c0_58] : memref<2x1x128xf32, #tpu.memory_space<vmem>>, vector<1x1x128xf32>
    %95 = vector.shape_cast %94 : vector<1x1x128xf32> to vector<1x128xf32>
    %96 = vector.broadcast %95 : vector<1x128xf32> to vector<64x128xf32>
    %97 = arith.addf %93, %96 : vector<64x128xf32>
    %c0_59 = arith.constant 0 : index
    %c0_60 = arith.constant 0 : index
    %98 = vector.load %arg10[%c0_59, %c0_60] : memref<64x128xf32, #tpu.memory_space<vmem>>, vector<64x128xf32>
    tpu.vector_store %arg10[%c0_59, %c0_60], %97 {strides = array<i32>} : memref<64x128xf32, #tpu.memory_space<vmem>>, vector<64x128xf32>,
    %c1_61 = arith.constant 1 : index
    %c0_62 = arith.constant 0 : index
    %c0_63 = arith.constant 0 : index
    %99 = vector.load %arg12[%c1_61, %c0_62, %c0_63] : memref<2x128x128xf32, #tpu.memory_space<vmem>>, vector<1x128x128xf32>
    %100 = vector.shape_cast %99 : vector<1x128x128xf32> to vector<128x128xf32>
    %c1_64 = arith.constant 1 : index
    %c0_65 = arith.constant 0 : index
    %c0_66 = arith.constant 0 : index
    %101 = vector.load %arg9[%c1_64, %c0_65, %c0_66] : memref<2x8x128xf32, #tpu.memory_space<vmem>>, vector<1x8x128xf32>
    %102 = vector.shape_cast %101 : vector<1x8x128xf32> to vector<8x128xf32>
    %c0_i32_67 = arith.constant 0 : i32
    %c8_i32_68 = arith.constant 8 : i32
    %103 = arith.muli %c0_i32_67, %c8_i32_68 : i32
    %104 = tpu.assume_multiple %103, 8 : i32
    %105 = arith.index_cast %104 : i32 to index
    %c0_69 = arith.constant 0 : index
    %106 = vector.load %arg10[%105, %c0_69] : memref<64x128xf32, #tpu.memory_space<vmem>>, vector<8x128xf32>
    %cst_70 = arith.constant dense<0.000000e+00> : vector<8x128xf32>
    %107 = tpu.matmul %102, %100, %cst_70 {dimension_numbers = #tpu.dot_dimension_numbers<[1], [0], [0], [1], [0, 0, 1, 1], [], []>} : vector<8x128xf32>, vector<128x128xf32>, vector<8x128xf32> -> vector<8x128xf32>
    %108 = arith.addf %106, %107 : vector<8x128xf32>
    %109 = math.tanh %108 : vector<8x128xf32>
    %110 = arith.index_cast %104 : i32 to index
    %c0_71 = arith.constant 0 : index
    %111 = vector.load %arg7[%110, %c0_71] : memref<64x128xf32, #tpu.memory_space<vmem>>, vector<8x128xf32>
    tpu.vector_store %arg7[%110, %c0_71], %109 {strides = array<i32>} : memref<64x128xf32, #tpu.memory_space<vmem>>, vector<8x128xf32>,
    %c1_i32_72 = arith.constant 1 : i32
    %c8_i32_73 = arith.constant 8 : i32
    %112 = arith.muli %c1_i32_72, %c8_i32_73 : i32
    %113 = tpu.assume_multiple %112, 8 : i32
    %114 = arith.index_cast %113 : i32 to index
    %c0_74 = arith.constant 0 : index
    %115 = vector.load %arg10[%114, %c0_74] : memref<64x128xf32, #tpu.memory_space<vmem>>, vector<8x128xf32>
    %cst_75 = arith.constant dense<0.000000e+00> : vector<8x128xf32>
    %116 = tpu.matmul %109, %100, %cst_75 {dimension_numbers = #tpu.dot_dimension_numbers<[1], [0], [0], [1], [0, 0, 1, 1], [], []>} : vector<8x128xf32>, vector<128x128xf32>, vector<8x128xf32> -> vector<8x128xf32>
    %117 = arith.addf %115, %116 : vector<8x128xf32>
    %118 = math.tanh %117 : vector<8x128xf32>
    %119 = arith.index_cast %113 : i32 to index
    %c0_76 = arith.constant 0 : index
    %120 = vector.load %arg7[%119, %c0_76] : memref<64x128xf32, #tpu.memory_space<vmem>>, vector<8x128xf32>
    tpu.vector_store %arg7[%119, %c0_76], %118 {strides = array<i32>} : memref<64x128xf32, #tpu.memory_space<vmem>>, vector<8x128xf32>,
    %c2_i32_77 = arith.constant 2 : i32
    %c8_i32_78 = arith.constant 8 : i32
    %121 = arith.muli %c2_i32_77, %c8_i32_78 : i32
    %122 = tpu.assume_multiple %121, 8 : i32
    %123 = arith.index_cast %122 : i32 to index
    %c0_79 = arith.constant 0 : index
    %124 = vector.load %arg10[%123, %c0_79] : memref<64x128xf32, #tpu.memory_space<vmem>>, vector<8x128xf32>
    %cst_80 = arith.constant dense<0.000000e+00> : vector<8x128xf32>
    %125 = tpu.matmul %118, %100, %cst_80 {dimension_numbers = #tpu.dot_dimension_numbers<[1], [0], [0], [1], [0, 0, 1, 1], [], []>} : vector<8x128xf32>, vector<128x128xf32>, vector<8x128xf32> -> vector<8x128xf32>
    %126 = arith.addf %124, %125 : vector<8x128xf32>
    %127 = math.tanh %126 : vector<8x128xf32>
    %128 = arith.index_cast %122 : i32 to index
    %c0_81 = arith.constant 0 : index
    %129 = vector.load %arg7[%128, %c0_81] : memref<64x128xf32, #tpu.memory_space<vmem>>, vector<8x128xf32>
    tpu.vector_store %arg7[%128, %c0_81], %127 {strides = array<i32>} : memref<64x128xf32, #tpu.memory_space<vmem>>, vector<8x128xf32>,
    %c3_i32_82 = arith.constant 3 : i32
    %c8_i32_83 = arith.constant 8 : i32
    %130 = arith.muli %c3_i32_82, %c8_i32_83 : i32
    %131 = tpu.assume_multiple %130, 8 : i32
    %132 = arith.index_cast %131 : i32 to index
    %c0_84 = arith.constant 0 : index
    %133 = vector.load %arg10[%132, %c0_84] : memref<64x128xf32, #tpu.memory_space<vmem>>, vector<8x128xf32>
    %cst_85 = arith.constant dense<0.000000e+00> : vector<8x128xf32>
    %134 = tpu.matmul %127, %100, %cst_85 {dimension_numbers = #tpu.dot_dimension_numbers<[1], [0], [0], [1], [0, 0, 1, 1], [], []>} : vector<8x128xf32>, vector<128x128xf32>, vector<8x128xf32> -> vector<8x128xf32>
    %135 = arith.addf %133, %134 : vector<8x128xf32>
    %136 = math.tanh %135 : vector<8x128xf32>
    %137 = arith.index_cast %131 : i32 to index
    %c0_86 = arith.constant 0 : index
    %138 = vector.load %arg7[%137, %c0_86] : memref<64x128xf32, #tpu.memory_space<vmem>>, vector<8x128xf32>
    tpu.vector_store %arg7[%137, %c0_86], %136 {strides = array<i32>} : memref<64x128xf32, #tpu.memory_space<vmem>>, vector<8x128xf32>,
    %c4_i32_87 = arith.constant 4 : i32
    %c8_i32_88 = arith.constant 8 : i32
    %139 = arith.muli %c4_i32_87, %c8_i32_88 : i32
    %140 = tpu.assume_multiple %139, 8 : i32
    %141 = arith.index_cast %140 : i32 to index
    %c0_89 = arith.constant 0 : index
    %142 = vector.load %arg10[%141, %c0_89] : memref<64x128xf32, #tpu.memory_space<vmem>>, vector<8x128xf32>
    %cst_90 = arith.constant dense<0.000000e+00> : vector<8x128xf32>
    %143 = tpu.matmul %136, %100, %cst_90 {dimension_numbers = #tpu.dot_dimension_numbers<[1], [0], [0], [1], [0, 0, 1, 1], [], []>} : vector<8x128xf32>, vector<128x128xf32>, vector<8x128xf32> -> vector<8x128xf32>
    %144 = arith.addf %142, %143 : vector<8x128xf32>
    %145 = math.tanh %144 : vector<8x128xf32>
    %146 = arith.index_cast %140 : i32 to index
    %c0_91 = arith.constant 0 : index
    %147 = vector.load %arg7[%146, %c0_91] : memref<64x128xf32, #tpu.memory_space<vmem>>, vector<8x128xf32>
    tpu.vector_store %arg7[%146, %c0_91], %145 {strides = array<i32>} : memref<64x128xf32, #tpu.memory_space<vmem>>, vector<8x128xf32>,
    %c5_i32_92 = arith.constant 5 : i32
    %c8_i32_93 = arith.constant 8 : i32
    %148 = arith.muli %c5_i32_92, %c8_i32_93 : i32
    %149 = tpu.assume_multiple %148, 8 : i32
    %150 = arith.index_cast %149 : i32 to index
    %c0_94 = arith.constant 0 : index
    %151 = vector.load %arg10[%150, %c0_94] : memref<64x128xf32, #tpu.memory_space<vmem>>, vector<8x128xf32>
    %cst_95 = arith.constant dense<0.000000e+00> : vector<8x128xf32>
    %152 = tpu.matmul %145, %100, %cst_95 {dimension_numbers = #tpu.dot_dimension_numbers<[1], [0], [0], [1], [0, 0, 1, 1], [], []>} : vector<8x128xf32>, vector<128x128xf32>, vector<8x128xf32> -> vector<8x128xf32>
    %153 = arith.addf %151, %152 : vector<8x128xf32>
    %154 = math.tanh %153 : vector<8x128xf32>
    %155 = arith.index_cast %149 : i32 to index
    %c0_96 = arith.constant 0 : index
    %156 = vector.load %arg7[%155, %c0_96] : memref<64x128xf32, #tpu.memory_space<vmem>>, vector<8x128xf32>
    tpu.vector_store %arg7[%155, %c0_96], %154 {strides = array<i32>} : memref<64x128xf32, #tpu.memory_space<vmem>>, vector<8x128xf32>,
    %c6_i32_97 = arith.constant 6 : i32
    %c8_i32_98 = arith.constant 8 : i32
    %157 = arith.muli %c6_i32_97, %c8_i32_98 : i32
    %158 = tpu.assume_multiple %157, 8 : i32
    %159 = arith.index_cast %158 : i32 to index
    %c0_99 = arith.constant 0 : index
    %160 = vector.load %arg10[%159, %c0_99] : memref<64x128xf32, #tpu.memory_space<vmem>>, vector<8x128xf32>
    %cst_100 = arith.constant dense<0.000000e+00> : vector<8x128xf32>
    %161 = tpu.matmul %154, %100, %cst_100 {dimension_numbers = #tpu.dot_dimension_numbers<[1], [0], [0], [1], [0, 0, 1, 1], [], []>} : vector<8x128xf32>, vector<128x128xf32>, vector<8x128xf32> -> vector<8x128xf32>
    %162 = arith.addf %160, %161 : vector<8x128xf32>
    %163 = math.tanh %162 : vector<8x128xf32>
    %164 = arith.index_cast %158 : i32 to index
    %c0_101 = arith.constant 0 : index
    %165 = vector.load %arg7[%164, %c0_101] : memref<64x128xf32, #tpu.memory_space<vmem>>, vector<8x128xf32>
    tpu.vector_store %arg7[%164, %c0_101], %163 {strides = array<i32>} : memref<64x128xf32, #tpu.memory_space<vmem>>, vector<8x128xf32>,
    %c7_i32_102 = arith.constant 7 : i32
    %c8_i32_103 = arith.constant 8 : i32
    %166 = arith.muli %c7_i32_102, %c8_i32_103 : i32
    %167 = tpu.assume_multiple %166, 8 : i32
    %168 = arith.index_cast %167 : i32 to index
    %c0_104 = arith.constant 0 : index
    %169 = vector.load %arg10[%168, %c0_104] : memref<64x128xf32, #tpu.memory_space<vmem>>, vector<8x128xf32>
    %cst_105 = arith.constant dense<0.000000e+00> : vector<8x128xf32>
    %170 = tpu.matmul %163, %100, %cst_105 {dimension_numbers = #tpu.dot_dimension_numbers<[1], [0], [0], [1], [0, 0, 1, 1], [], []>} : vector<8x128xf32>, vector<128x128xf32>, vector<8x128xf32> -> vector<8x128xf32>
    %171 = arith.addf %169, %170 : vector<8x128xf32>
    %172 = math.tanh %171 : vector<8x128xf32>
    %173 = arith.index_cast %167 : i32 to index
    %c0_106 = arith.constant 0 : index
    %174 = vector.load %arg7[%173, %c0_106] : memref<64x128xf32, #tpu.memory_space<vmem>>, vector<8x128xf32>
    tpu.vector_store %arg7[%173, %c0_106], %172 {strides = array<i32>} : memref<64x128xf32, #tpu.memory_space<vmem>>, vector<8x128xf32>,
    %c8_i32_107 = arith.constant 8 : i32
    %c1_108 = arith.constant 1 : index
    %c0_109 = arith.constant 0 : index
    %c0_110 = arith.constant 0 : index
    %175 = vector.load %arg9[%c1_108, %c0_109, %c0_110] : memref<2x8x128xf32, #tpu.memory_space<vmem>>, vector<1x8x128xf32>
    %176 = vector.shape_cast %175 : vector<1x8x128xf32> to vector<8x128xf32>
    %177 = vector.shape_cast %172 : vector<8x128xf32> to vector<1x8x128xf32>
    tpu.vector_store %arg9[%c1_108, %c0_109, %c0_110], %177 {strides = array<i32>} : memref<2x8x128xf32, #tpu.memory_space<vmem>>, vector<1x8x128xf32>,
    %c0_i32_111 = arith.constant 0 : i32
    %178 = arith.cmpi eq, %arg0, %c0_i32_111 : i32
    %179 = arith.extui %178 : i1 to i32
    %c0_i32_112 = arith.constant 0 : i32
    %180 = arith.cmpi ne, %179, %c0_i32_112 : i32
    scf.if %180 {
      %c0_113 = arith.constant 0 : index
      %c0_114 = arith.constant 0 : index
      %c0_115 = arith.constant 0 : index
      %181 = vector.load %arg9[%c0_113, %c0_114, %c0_115] : memref<2x8x128xf32, #tpu.memory_space<vmem>>, vector<2x8x128xf32>
      %c0_116 = arith.constant 0 : index
      %c0_117 = arith.constant 0 : index
      %c0_118 = arith.constant 0 : index
      %182 = vector.load %arg8[%c0_116, %c0_117, %c0_118] : memref<2x8x128xf32, #tpu.memory_space<vmem>>, vector<2x8x128xf32>
      tpu.vector_store %arg8[%c0_116, %c0_117, %c0_118], %181 {strides = array<i32>} : memref<2x8x128xf32, #tpu.memory_space<vmem>>, vector<2x8x128xf32>,
    } else {
    }
    return
  }
  func.func @transform_0(%arg0: i32) -> (i32, i32) {
    %c0_i32 = arith.constant 0 : i32
    %c0_i32_0 = arith.constant 0 : i32
    return %arg0, %c0_i32 : i32, i32
  }
  func.func @transform_1(%arg0: i32) -> (i32, i32, i32) {
    %c0_i32 = arith.constant 0 : i32
    %c0_i32_0 = arith.constant 0 : i32
    %c0_i32_1 = arith.constant 0 : i32
    %c0_i32_2 = arith.constant 0 : i32
    return %c0_i32, %c0_i32_0, %c0_i32_1 : i32, i32, i32
  }
  func.func @transform_2(%arg0: i32) -> (i32, i32, i32) {
    %c0_i32 = arith.constant 0 : i32
    %c0_i32_0 = arith.constant 0 : i32
    %c0_i32_1 = arith.constant 0 : i32
    %c0_i32_2 = arith.constant 0 : i32
    return %c0_i32, %c0_i32_0, %c0_i32_1 : i32, i32, i32
  }
  func.func @transform_6(%arg0: i32) -> (i32, i32) {
    %c0_i32 = arith.constant 0 : i32
    %c0_i32_0 = arith.constant 0 : i32
    return %arg0, %c0_i32 : i32, i32
  }
  func.func @transform_7(%arg0: i32) -> (i32, i32, i32) {
    %c0_i32 = arith.constant 0 : i32
    %c0_i32_0 = arith.constant 0 : i32
    %c0_i32_1 = arith.constant 0 : i32
    %c0_i32_2 = arith.constant 0 : i32
    return %c0_i32, %c0_i32_0, %c0_i32_1 : i32, i32, i32
  }
}

</mosaic_0001>

<bundles_post_ra>
// kernel: tpu_custom_call.1
= control target key start
LH: loop header
LB: loop body
LE: loop exit
PB: predicated region body
PF: predicated region fallthrough
CT: control target
= control target key end

     0   :  { %13 = vsyncpa [#allocation9], 0  ;;  %s3867_s0 = inlined_call_operand.hbm [shape: f32[64,128], index: 0, kind: input, shape index: {}]   ;;  %s3868_s1 = inlined_call_operand.hbm [shape: f32[2,8,128], index: 1, kind: input, shape index: {}]   ;;  %s3869_s2 = inlined_call_operand.vmem [shape: f32[2,1,128], index: 2, kind: input, shape index: {}]   ;;  %s3870_s3 = inlined_call_operand.hbm [shape: f32[128,128], index: 3, kind: input, shape index: {}]   ;;  %s3871_s4 = inlined_call_operand.hbm [shape: f32[1,128,128], index: 4, kind: input, shape index: {}]   ;;  %s3872_s5 = inlined_call_operand.hbm [shape: f32[2,128,128], index: 5, kind: input, shape index: {}]   ;;  %s3873_s6 = inlined_call_operand.hbm [shape: f32[64,128], index: 6, kind: output, shape index: {0}]   ;;  %s3874_s7 = inlined_call_operand.hbm [shape: f32[2,8,128], index: 7, kind: output, shape index: {1}]  }
   0x1   :  { %14 = vsyncpa [#allocation12], 0 }
   0x2   :  { %15 = vsyncpa [#allocation10], 0 }
   0x3   :  { %16 = vsyncpa [#allocation15], 0  ;;  %s3313_s24 = smov [#allocation8]   ;;  %s3145_s28 = scalar_lea.hbm %s3867_s0, 1024 }
   0x4   :  { %s22_s25 = sshll.u32 %s3313_s24, 4  ;;  %p3146_p0 = scmp.ne.s32.totalorder %s3867_s0, %s3145_s28  ;;  %s23_s25 = int_to_ptr.vmem [resolvable:$true] %s22_s25 }
   0x5   :  { %p3149_p1 = scmp.lt.u32.totalorder %s3145_s28, %s3867_s0 }
   0x7   :  { %p3151_p2 = pnand %p3149_p1, %p3146_p0 }
   0x9   :  { %3154 = shalt.err (!%p3151_p2)
}
   0xa   :  { %s3155_s10 = scalar_lea.vmem %s23_s25, 1024  ;;  %p3160_p4 = scmp.lt.s32.totalorder %s23_s25, %s23_s25 }
   0xb   :  { %p3156_p3 = scmp.ne.s32.totalorder %s23_s25, %s3155_s10  ;;  %p3161_p5 = scmp.lt.s32.totalorder %s3155_s10, %s3155_s10 }
   0xd   :  { %p3162_p6 = por %p3161_p5, %p3160_p4 }
   0xf   :  { %p3163_p7 = pnand %p3162_p6, %p3156_p3 }
  0x11   :  { %3166 = shalt.err (!%p3163_p7)
}
  0x12   :  { %s3314_s11 = smov 128   ;;  %s3315_s12 = smov 8  }
  0x13   :  { %28 = dma.hbm_to_vmem [thread:$0]  %s3867_s0, 1024, %s23_s25, [#allocation9], %s3314_s11, %s3314_s11, %s3315_s12  }
  0x14   :  { %s3316_s15 = smov [#allocation11]   ;;  %s3167_s19 = scalar_lea.hbm %s3868_s1, 256 }
  0x15   :  { %s34_s16 = sshll.u32 %s3316_s15, 4  ;;  %p3168_p8 = scmp.ne.s32.totalorder %s3868_s1, %s3167_s19  ;;  %s35_s16 = int_to_ptr.vmem [resolvable:$true] %s34_s16 }
  0x16   :  { %p3171_p9 = scmp.lt.u32.totalorder %s3167_s19, %s3868_s1 }
  0x18   :  { %p3173_p10 = pnand %p3171_p9, %p3168_p8 }
  0x1a   :  { %3176 = shalt.err (!%p3173_p10)
}
  0x1b   :  { %s3177_s24 = scalar_lea.vmem %s35_s16, 256  ;;  %p3182_p12 = scmp.lt.s32.totalorder %s35_s16, %s35_s16 }
  0x1c   :  { %p3178_p11 = scmp.ne.s32.totalorder %s35_s16, %s3177_s24  ;;  %p3183_p13 = scmp.lt.s32.totalorder %s3177_s24, %s3177_s24 }
  0x1e   :  { %p3184_p0 = por %p3183_p13, %p3182_p12 }
  0x20   :  { %p3185_p1 = pnand %p3184_p0, %p3178_p11 }
  0x22   :  { %3188 = shalt.err (!%p3185_p1)
}
  0x23   :  { %40 = dma.hbm_to_vmem [thread:$0]  %s3868_s1, 256, %s35_s16, [#allocation12], %s3314_s11, %s3314_s11, %s3315_s12  }
  0x24   :  { %3299 = dma.done.wait [#allocation9], 1024  }
  0x25   :  { %3300 = vsyncadd [#allocation9], 4294966272 }
  0x26   :  { %3301 = dma.done.wait [#allocation12], 256  }
  0x27   :  { %3302 = vsyncadd [#allocation12], 4294967040 }
  0x28   :  { %s3317_s26 = smov [#allocation4]   ;;  %s3189_s30 = scalar_lea.hbm %s3870_s3, 2048 }
  0x29   :  { %s60_s27 = sshll.u32 %s3317_s26, 4  ;;  %p3190_p2 = scmp.ne.s32.totalorder %s3870_s3, %s3189_s30  ;;  %s61_s27 = int_to_ptr.vmem [resolvable:$true] %s60_s27 }
  0x2a   :  { %p3193_p3 = scmp.lt.u32.totalorder %s3189_s30, %s3870_s3 }
  0x2c   :  { %p3195_p4 = pnand %p3193_p3, %p3190_p2 }
  0x2e   :  { %3198 = shalt.err (!%p3195_p4)  }
  0x2f   :  { %s3199_s1 = scalar_lea.vmem %s61_s27, 2048  ;;  %p3204_p6 = scmp.lt.s32.totalorder %s61_s27, %s61_s27 }
  0x30   :  { %p3200_p5 = scmp.ne.s32.totalorder %s61_s27, %s3199_s1  ;;  %p3205_p7 = scmp.lt.s32.totalorder %s3199_s1, %s3199_s1 }
  0x32   :  { %p3206_p8 = por %p3205_p7, %p3204_p6 }
  0x34   :  { %p3207_p9 = pnand %p3206_p8, %p3200_p5 }
  0x36   :  { %3210 = shalt.err (!%p3207_p9)  }
  0x37   :  { %63 = dma.hbm_to_vmem [thread:$0]  %s3870_s3, 2048, %s61_s27, [#allocation16] }
  0x38   :  { %3303 = dma.done.wait [#allocation16], 2048 }
  0x39   :  { %3304 = vsyncadd [#allocation16], 4294965248 }
  0x3a   :  { %s3318_s16 = smov [#allocation5]   ;;  %s3211_s20 = scalar_lea.hbm %s3872_s5, 4096 }
  0x3b   :  { %s74_s17 = sshll.u32 %s3318_s16, 4  ;;  %p3212_p10 = scmp.ne.s32.totalorder %s3872_s5, %s3211_s20  ;;  %s75_s17 = int_to_ptr.vmem [resolvable:$true] %s74_s17 }
  0x3c   :  { %p3215_p11 = scmp.lt.u32.totalorder %s3211_s20, %s3872_s5 }
  0x3e   :  { %p3217_p12 = pnand %p3215_p11, %p3212_p10 }
  0x40   :  { %3220 = shalt.err (!%p3217_p12)  }
  0x41   :  { %s3221_s3 = scalar_lea.vmem %s75_s17, 4096  ;;  %p3226_p0 = scmp.lt.s32.totalorder %s75_s17, %s75_s17 }
  0x42   :  { %p3222_p13 = scmp.ne.s32.totalorder %s75_s17, %s3221_s3  ;;  %p3227_p1 = scmp.lt.s32.totalorder %s3221_s3, %s3221_s3 }
  0x44   :  { %p3228_p2 = por %p3227_p1, %p3226_p0 }
  0x46   :  { %p3229_p3 = pnand %p3228_p2, %p3222_p13 }
  0x48   :  { %3232 = shalt.err (!%p3229_p3)  }
  0x49   :  { %77 = dma.hbm_to_vmem [thread:$0]  %s3872_s5, 4096, %s75_s17, [#allocation21] }
  0x4a   :  { %3305 = dma.done.wait [#allocation21], 4096 }
  0x4b   :  { %3306 = vsyncadd [#allocation21], 4294963200 }
  0x4c   :  { %s3319_s26 = smov [#allocation7]   ;;  %s3233_s30 = scalar_lea.hbm %s3871_s4, 2048 }
  0x4d   :  { %s89_s27 = sshll.u32 %s3319_s26, 4  ;;  %p3234_p4 = scmp.ne.s32.totalorder %s3871_s4, %s3233_s30  ;;  %s90_s27 = int_to_ptr.vmem [resolvable:$true] %s89_s27 }
  0x4e   :  { %p3237_p5 = scmp.lt.u32.totalorder %s3233_s30, %s3871_s4 }
  0x50   :  { %p3239_p6 = pnand %p3237_p5, %p3234_p4 }
  0x52   :  { %3242 = shalt.err (!%p3239_p6)  }
  0x53   :  { %s3243_s5 = scalar_lea.vmem %s90_s27, 2048  ;;  %p3248_p8 = scmp.lt.s32.totalorder %s90_s27, %s90_s27 }
  0x54   :  { %p3244_p7 = scmp.ne.s32.totalorder %s90_s27, %s3243_s5  ;;  %p3249_p9 = scmp.lt.s32.totalorder %s3243_s5, %s3243_s5 }
  0x56   :  { %p3250_p10 = por %p3249_p9, %p3248_p8 }
  0x58   :  { %p3251_p11 = pnand %p3250_p10, %p3244_p7 }
  0x5a   :  { %3254 = shalt.err (!%p3251_p11)  }
  0x5b   :  { %92 = dma.hbm_to_vmem [thread:$0]  %s3871_s4, 2048, %s90_s27, [#allocation24] }
  0x5c   :  { %3307 = dma.done.wait [#allocation24], 2048 }
  0x5d   :  { %3308 = vsyncadd [#allocation24], 4294965248  ;;  %v117_v0 = vld [vmem:[#allocation4] sm:$0xff]  ;;  %v118_v1 = vld [vmem:[#allocation4 + $0x8] sm:$0xff]  ;;  %v3320_v4 = vmov 0.0|0.0   ;;  %vm3321_vm0 = vmmov 0  }
  0x5e   :  { %v253_v2 = vld [vmem:[#allocation5] sm:$0xff]  ;;  %v2653_v3 = vpack.c.bf16 %v118_v1, %v117_v0  ;;  %2685 = vmatprep.subr.bf16.mxu1 %v3320_v4  ;;  %v254_v5 = vld [vmem:[#allocation5 + $0x8] sm:$0xff]  ;;  %v119_v6 = vld [vmem:[#allocation4 + $0x10] sm:$0xff]  ;;  %v3322_v8 = vmov 0.0   ;;  %s3324_s19 = smov [#allocation14]  }
  0x5f   :  { %v120_v7 = vld [vmem:[#allocation4 + $0x18] sm:$0xff]  ;;  %2081 = vmatprep.mubr.msk.f32.mxu1 %vm3321_vm0, %v3322_v8  ;;  %v3434_v9 = vpack.c.bf16 %v254_v5, %v253_v2  ;;  %v255_v11 = vld [vmem:[#allocation5 + $0x10] sm:$0xff]  ;;  %v121_v13 = vld [vmem:[#allocation4 + $0x20] sm:$0xff]  ;;  %s1665_s20 = sshll.u32 %s3324_s19, 4  ;;  %s3830_s20 = int_to_ptr.vmem [resolvable:$true] %s1665_s20 }
  0x60   :  { %v2657_v10 = vpack.c.bf16 %v120_v7, %v119_v6  ;;  %v256_v12 = vld [vmem:[#allocation5 + $0x18] sm:$0xff]  ;;  %2654 = vmatprep.subr.bf16.mxu0 %v2653_v3  ;;  %v122_v14 = vld [vmem:[#allocation4 + $0x28] sm:$0xff]  ;;  %v257_v17 = vld [vmem:[#allocation5 + $0x20] sm:$0xff] }
  0x61   :  { %2656 = vmatpush3.bf16.msra.mxu0 %v2653_v3  ;;  %2687 = vmatpush3.bf16.msra.mxu1 %v3434_v9  ;;  %v3437_v15 = vpack.c.bf16 %v256_v12, %v255_v11  ;;  %v2661_v16 = vpack.c.bf16 %v122_v14, %v121_v13  ;;  %v258_v18 = vld [vmem:[#allocation5 + $0x28] sm:$0xff]  ;;  %v123_v19 = vld [vmem:[#allocation4 + $0x30] sm:$0xff]  ;;  %v124_v20 = vld [vmem:[#allocation4 + $0x38] sm:$0xff] }
  0x62   :  { %2658 = vmatprep.subr.bf16.mxu0 %v2657_v10  ;;  %2688 = vmatprep.subr.bf16.mxu1 %v3320_v4  ;;  %v3441_v21 = vpack.c.bf16 %v258_v18, %v257_v17  ;;  %v2665_v22 = vpack.c.bf16 %v124_v20, %v123_v19  ;;  %v259_v23 = vld [vmem:[#allocation5 + $0x30] sm:$0xff]  ;;  %v260_v24 = vld [vmem:[#allocation5 + $0x38] sm:$0xff]  ;;  %v125_v25 = vld [vmem:[#allocation4 + $0x40] sm:$0xff] }
  0x63   :  { %v126_v26 = vld [vmem:[#allocation4 + $0x48] sm:$0xff]  ;;  %v109_v27 = vld [vmem:[#allocation8] sm:$0xff]  ;;  %v3445_v28 = vpack.c.bf16 %v260_v24, %v259_v23  ;;  %v127_v32 = vld [vmem:[#allocation4 + $0x50] sm:$0xff] }
  0x64   :  { %2037 = vmatprep.mubr.f32.mxu0 %v109_v27  ;;  %v2669_v29 = vpack.c.bf16 %v126_v26, %v125_v25  ;;  %v261_v30 = vld [vmem:[#allocation5 + $0x40] sm:$0xff]  ;;  %v262_v31 = vld [vmem:[#allocation5 + $0x48] sm:$0xff]  ;;  %v128_v33 = vld [vmem:[#allocation4 + $0x58] sm:$0xff] }
  0x65   :  { %2660 = vmatpush3.bf16.msra.mxu0 %v2657_v10  ;;  %2690 = vmatpush3.bf16.msra.mxu1 %v3437_v15  ;;  %v3449_v34 = vpack.c.bf16 %v262_v31, %v261_v30  ;;  %v2673_v35 = vpack.c.bf16 %v128_v33, %v127_v32  ;;  %v263_v36 = vld [vmem:[#allocation5 + $0x50] sm:$0xff]  ;;  %v264_v37 = vld [vmem:[#allocation5 + $0x58] sm:$0xff]  ;;  %v129_v38 = vld [vmem:[#allocation4 + $0x60] sm:$0xff] }
  0x66   :  { %2662 = vmatprep.subr.bf16.mxu0 %v2661_v16  ;;  %2691 = vmatprep.subr.bf16.mxu1 %v3320_v4  ;;  %v130_v39 = vld [vmem:[#allocation4 + $0x68] sm:$0xff]  ;;  %v3453_v40 = vpack.c.bf16 %v264_v37, %v263_v36  ;;  %v265_v42 = vld [vmem:[#allocation5 + $0x60] sm:$0xff]  ;;  %v131_v44 = vld [vmem:[#allocation4 + $0x70] sm:$0xff] }
  0x67   :  { %v2677_v41 = vpack.c.bf16 %v130_v39, %v129_v38  ;;  %v266_v43 = vld [vmem:[#allocation5 + $0x68] sm:$0xff]  ;;  %v132_v45 = vld [vmem:[#allocation4 + $0x78] sm:$0xff]  ;;  %v267_v48 = vld [vmem:[#allocation5 + $0x70] sm:$0xff] }
  0x68   :  { %v3457_v46 = vpack.c.bf16 %v266_v43, %v265_v42  ;;  %v2681_v47 = vpack.c.bf16 %v132_v45, %v131_v44  ;;  %v268_v49 = vld [vmem:[#allocation5 + $0x78] sm:$0xff]  ;;  %v110_v51 = vld [vmem:[#allocation8 + $0x8] sm:$0xff]  ;;  %v105_v52 = vld [vmem:[#allocation11] sm:$0xff] }
  0x69   :  { %2664 = vmatpush3.bf16.msra.mxu0 %v2661_v16  ;;  %2693 = vmatpush3.bf16.msra.mxu1 %v3441_v21  ;;  %v3461_v50 = vpack.c.bf16 %v268_v49, %v267_v48  ;;  %v111_v53 = vld [vmem:[#allocation8 + $0x10] sm:$0xff]  ;;  %v112_v54 = vld [vmem:[#allocation8 + $0x18] sm:$0xff]  ;;  %v113_v55 = vld [vmem:[#allocation8 + $0x20] sm:$0xff] }
  0x6a   :  { %2666 = vmatprep.subr.bf16.mxu0 %v2665_v22  ;;  %2694 = vmatprep.subr.bf16.mxu1 %v3320_v4  ;;  %v114_v56 = vld [vmem:[#allocation8 + $0x28] sm:$0xff]  ;;  %v115_v57 = vld [vmem:[#allocation8 + $0x30] sm:$0xff]  ;;  %v116_v58 = vld [vmem:[#allocation8 + $0x38] sm:$0xff] }
  0x6b   :  { %v3506_v59 = vld [vmem:[%s3869_s2] ss:$0 sm:$0xff]  ;;  %v887_v38 = vld [vmem:[#allocation7 + $0x10] sm:$0xff]  ;;  %v888_v39 = vld [vmem:[#allocation7 + $0x18] sm:$0xff] }
  0x6c   :  { %v889_v42 = vld [vmem:[#allocation7 + $0x20] sm:$0xff]  ;;  %v890_v43 = vld [vmem:[#allocation7 + $0x28] sm:$0xff]  ;;  %v891_v45 = vld [vmem:[#allocation7 + $0x30] sm:$0xff] }
  0x6d   :  { %2668 = vmatpush3.bf16.msra.mxu0 %v2665_v22  ;;  %2696 = vmatpush3.bf16.msra.mxu1 %v3445_v28  ;;  %v2885_v44 = vpack.c.bf16 %v890_v43, %v889_v42  ;;  %v893_v48 = vld [vmem:[#allocation7 + $0x40] sm:$0xff]  ;;  %v894_v49 = vld [vmem:[#allocation7 + $0x48] sm:$0xff] }
  0x6e   :  { %2670 = vmatprep.subr.bf16.mxu0 %v2669_v29  ;;  %2697 = vmatprep.subr.bf16.mxu1 %v3320_v4 }
  0x71   :  { %2672 = vmatpush3.bf16.msra.mxu0 %v2669_v29  ;;  %2699 = vmatpush3.bf16.msra.mxu1 %v3449_v34 }
  0x72   :  { %2674 = vmatprep.subr.bf16.mxu0 %v2673_v35  ;;  %2700 = vmatprep.subr.bf16.mxu1 %v3320_v4 }
  0x75   :  { %2676 = vmatpush3.bf16.msra.mxu0 %v2673_v35  ;;  %2702 = vmatpush3.bf16.msra.mxu1 %v3453_v40 }
  0x76   :  { %2678 = vmatprep.subr.bf16.mxu0 %v2677_v41  ;;  %2703 = vmatprep.subr.bf16.mxu1 %v3320_v4 }
  0x79   :  { %2680 = vmatpush3.bf16.msra.mxu0 %v2677_v41  ;;  %2705 = vmatpush3.bf16.msra.mxu1 %v3457_v46 }
  0x7a   :  { %2682 = vmatprep.subr.bf16.mxu0 %v2681_v47  ;;  %2706 = vmatprep.subr.bf16.mxu1 %v3320_v4 }
  0x7d   :  { %2684 = vmatpush3.bf16.msra.mxu0 %v2681_v47  ;;  %2708 = vmatpush3.bf16.msra.mxu1 %v3461_v50 }
  0x7e   :  { %2709 = vmatprep.subr.bf16.mxu0 %v3320_v4  ;;  %2733 = vmatprep.subr.bf16.mxu1 %v3320_v4 }
  0x80   :  { %2038 = vmatmul.mubr.f32.vlgmr.msra.gmra.mrb[0].mxu0 %v110_v51  ;;  %2082 = vmatmul.mubr.f32.vlgmr.msra.gmra.mrb[0].mxu1 %v105_v52  ;;  %v895_v51 = vld [vmem:[#allocation7 + $0x50] sm:$0xff]  ;;  %v896_v52 = vld [vmem:[#allocation7 + $0x58] sm:$0xff] }
  0x81   :  { %2711 = vmatpush3.bf16.msra.mxu0 %v3434_v9  ;;  %2735 = vmatpush3.bf16.msra.mxu1 %v3434_v9 }
  0x82   :  { %2712 = vmatprep.subr.bf16.mxu0 %v3320_v4  ;;  %2736 = vmatprep.subr.bf16.mxu1 %v3320_v4 }
  0x83   :  { %2151 = vmatprep.mubr.msk.f32.mxu1 %vm3321_vm0, %v3322_v8  ;;  %2040 = vmatprep.mubr.f32.mxu0 %v111_v53  ;;  %v2897_v53 = vpack.c.bf16 %v896_v52, %v895_v51 }
  0x84   :  { %2041 = vmatmul.mubr.f32.gmra.mrb[2].mxu0 %v112_v54  ;;  %v897_v54 = vld [vmem:[#allocation7 + $0x60] sm:$0xff] }
  0x85   :  { %2714 = vmatpush3.bf16.msra.mxu0 %v3437_v15  ;;  %2738 = vmatpush3.bf16.msra.mxu1 %v3437_v15 }
  0x86   :  { %2715 = vmatprep.subr.bf16.mxu0 %v3320_v4  ;;  %2739 = vmatprep.subr.bf16.mxu1 %v3320_v4 }
  0x87   :  { %2043 = vmatprep.mubr.f32.mxu0 %v113_v55  ;;  %v898_v55 = vld [vmem:[#allocation7 + $0x68] sm:$0xff] }
  0x88   :  { %2044 = vmatmul.mubr.f32.gmra.mrb[4].mxu0 %v114_v56  ;;  %v2901_v56 = vpack.c.bf16 %v898_v55, %v897_v54 }
  0x89   :  { %2717 = vmatpush3.bf16.msra.mxu0 %v3441_v21  ;;  %2741 = vmatpush3.bf16.msra.mxu1 %v3441_v21 }
  0x8a   :  { %2718 = vmatprep.subr.bf16.mxu0 %v3320_v4  ;;  %2742 = vmatprep.subr.bf16.mxu1 %v3320_v4 }
  0x8b   :  { %2046 = vmatprep.mubr.f32.mxu0 %v115_v57  ;;  %v899_v57 = vld [vmem:[#allocation7 + $0x70] sm:$0xff] }
  0x8c   :  { %2047 = vmatmul.mubr.f32.gmra.mrb[6].mxu0 %v116_v58  ;;  %v900_v58 = vld [vmem:[#allocation7 + $0x78] sm:$0xff] }
  0x8d   :  { %2720 = vmatpush3.bf16.msra.mxu0 %v3445_v28  ;;  %2744 = vmatpush3.bf16.msra.mxu1 %v3445_v28 }
  0x8e   :  { %2721 = vmatprep.subr.bf16.mxu0 %v3320_v4  ;;  %2745 = vmatprep.subr.bf16.mxu1 %v3320_v4 }
  0x8f   :  { %2116 = vmatprep.mubr.msk.f32.mxu0 %vm3321_vm0, %v3322_v8 }
  0x91   :  { %2723 = vmatpush3.bf16.msra.mxu0 %v3449_v34  ;;  %2747 = vmatpush3.bf16.msra.mxu1 %v3449_v34 }
  0x92   :  { %2724 = vmatprep.subr.bf16.mxu0 %v3320_v4  ;;  %2748 = vmatprep.subr.bf16.mxu1 %v3320_v4 }
  0x95   :  { %2726 = vmatpush3.bf16.msra.mxu0 %v3453_v40  ;;  %2750 = vmatpush3.bf16.msra.mxu1 %v3453_v40 }
  0x96   :  { %2727 = vmatprep.subr.bf16.mxu0 %v3320_v4  ;;  %2751 = vmatprep.subr.bf16.mxu1 %v3320_v4 }
  0x99   :  { %2729 = vmatpush3.bf16.msra.mxu0 %v3457_v46  ;;  %2753 = vmatpush3.bf16.msra.mxu1 %v3457_v46 }
  0x9a   :  { %2730 = vmatprep.subr.bf16.mxu0 %v3320_v4  ;;  %2754 = vmatprep.subr.bf16.mxu1 %v3320_v4 }
  0x9d   :  { %2732 = vmatpush3.bf16.msra.mxu0 %v3461_v50  ;;  %2756 = vmatpush3.bf16.msra.mxu1 %v3461_v50 }
  0x9e   :  { %2757 = vmatprep.subr.bf16.mxu0 %v3320_v4  ;;  %2781 = vmatprep.subr.bf16.mxu1 %v3320_v4 }
 0x153   :  { %v2039_v60 = vpop.f32.mrb[0].mxu0  ;;  %v337_v61 = vpop.f32.mrb[0].mxu1 }
 0x154   :  { %v206_v62 = vpop.f32.mrb[1].mxu0  ;;  %v2083_v63 = vpop.f32.mrb[1].mxu1  ;;  %v212_v12 = vadd.f32 %v2039_v60, %v3506_v59  ;;  %v2905_v60 = vpack.c.bf16 %v900_v58, %v899_v57 }
 0x155   :  { %v207_v0 = vadd.f32 %v3506_v59, %v206_v62  ;;  %v1024_v62 = vld [vmem:[#allocation5 + $0x88] sm:$0xff] }
 0x157   :  { %v341_v1 = vadd.f32 %v337_v61, %v207_v0  ;;  %v2042_v3 = vpop.f32.mrb[2].mxu0  ;;  %v1023_v61 = vld [vmem:[#allocation5 + $0x80] sm:$0xff]  ;;  %v1025_v0 = vld [vmem:[#allocation5 + $0x90] sm:$0xff] }
 0x158   :  { %v216_v5 = vpop.f32.mrb[3].mxu0  ;;  %v222_v24 = vadd.f32 %v2042_v3, %v3506_v59  ;;  %v3634_v63 = vpack.c.bf16 %v1024_v62, %v1023_v61  ;;  %v1027_v3 = vld [vmem:[#allocation5 + $0xa0] sm:$0xff] }
 0x159   :  { %3113 = vtanh.f32 %v341_v1  ;;  %v217_v18 = vadd.f32 %v3506_v59, %v216_v5  ;;  %v1026_v1 = vld [vmem:[#allocation5 + $0x98] sm:$0xff]  ;;  %v1028_v5 = vld [vmem:[#allocation5 + $0xa8] sm:$0xff] }
 0x15b   :  { %v3530_v6 = vpop.f32.mrb[4].mxu0 }
 0x15c   :  { %v3532_v7 = vpop.f32.mrb[5].mxu0 }
 0x15d   :  { %v227_v30 = vadd.f32 %v3506_v59, %v3532_v7  ;;  %v1029_v7 = vld [vmem:[#allocation5 + $0xb0] sm:$0xff] }
 0x15f   :  { %v3534_v10 = vpop.f32.mrb[6].mxu0 }
 0x160   :  { %v3536_v11 = vpop.f32.mrb[7].mxu0 }
 0x163   :  { %v3509_v2 = vpop.eup %3113 }
 0x164   :  { %2117 = vmatmul.mubr.f32.vlgmr.msra.gmra.mrb[8].mxu0 %v3509_v2 }
 0x165   :  { %2759 = vmatpush3.bf16.msra.mxu0 %v3434_v9  ;;  %2186 = vmatprep.mubr.msk.f32.mxu0 %vm3321_vm0, %v3322_v8 }
 0x166   :  { %2760 = vmatprep.subr.bf16.mxu0 %v3320_v4 }
 0x169   :  { %2762 = vmatpush3.bf16.msra.mxu0 %v3437_v15 }
 0x16a   :  { %2763 = vmatprep.subr.bf16.mxu0 %v3320_v4 }
 0x16d   :  { %2765 = vmatpush3.bf16.msra.mxu0 %v3441_v21 }
 0x16e   :  { %2766 = vmatprep.subr.bf16.mxu0 %v3320_v4 }
 0x171   :  { %2768 = vmatpush3.bf16.msra.mxu0 %v3445_v28 }
 0x172   :  { %2769 = vmatprep.subr.bf16.mxu0 %v3320_v4 }
 0x175   :  { %2771 = vmatpush3.bf16.msra.mxu0 %v3449_v34 }
 0x176   :  { %2772 = vmatprep.subr.bf16.mxu0 %v3320_v4 }
 0x179   :  { %2774 = vmatpush3.bf16.msra.mxu0 %v3453_v40 }
 0x17a   :  { %2775 = vmatprep.subr.bf16.mxu0 %v3320_v4 }
 0x17d   :  { %2777 = vmatpush3.bf16.msra.mxu0 %v3457_v46 }
 0x17e   :  { %2778 = vmatprep.subr.bf16.mxu0 %v3320_v4 }
 0x181   :  { %2780 = vmatpush3.bf16.msra.mxu0 %v3461_v50 }
 0x182   :  { %2805 = vmatprep.subr.bf16.mxu0 %v3320_v4 }
 0x237   :  { %v412_v13 = vpop.f32.mrb[8].mxu0 }
 0x238   :  { %v416_v14 = vadd.f32 %v412_v13, %v212_v12  ;;  %v2118_v16 = vpop.f32.mrb[9].mxu0  ;;  %v1030_v12 = vld [vmem:[#allocation5 + $0xb8] sm:$0xff] }
 0x239   :  { %v3646_v13 = vpack.c.bf16 %v1030_v12, %v1029_v7  ;;  %v1032_v16 = vld [vmem:[#allocation5 + $0xc8] sm:$0xff] }
 0x23a   :  { %3115 = vtanh.f32 %v416_v14  ;;  %v1031_v14 = vld [vmem:[#allocation5 + $0xc0] sm:$0xff] }
 0x244   :  { %v3539_v17 = vpop.eup %3115 }
 0x245   :  { %2152 = vmatmul.mubr.f32.vlgmr.msra.gmra.mrb[2].mxu1 %v3539_v17 }
 0x246   :  { %2783 = vmatpush3.bf16.msra.mxu1 %v3434_v9  ;;  %2221 = vmatprep.mubr.msk.f32.mxu1 %vm3321_vm0, %v3322_v8 }
 0x247   :  { %2784 = vmatprep.subr.bf16.mxu1 %v3320_v4 }
 0x24a   :  { %2786 = vmatpush3.bf16.msra.mxu1 %v3437_v15 }
 0x24b   :  { %2787 = vmatprep.subr.bf16.mxu1 %v3320_v4 }
 0x24e   :  { %2789 = vmatpush3.bf16.msra.mxu1 %v3441_v21 }
 0x24f   :  { %2790 = vmatprep.subr.bf16.mxu1 %v3320_v4 }
 0x252   :  { %2792 = vmatpush3.bf16.msra.mxu1 %v3445_v28 }
 0x253   :  { %2793 = vmatprep.subr.bf16.mxu1 %v3320_v4 }
 0x256   :  { %2795 = vmatpush3.bf16.msra.mxu1 %v3449_v34 }
 0x257   :  { %2796 = vmatprep.subr.bf16.mxu1 %v3320_v4 }
 0x25a   :  { %2798 = vmatpush3.bf16.msra.mxu1 %v3453_v40 }
 0x25b   :  { %2799 = vmatprep.subr.bf16.mxu1 %v3320_v4 }
 0x25e   :  { %2801 = vmatpush3.bf16.msra.mxu1 %v3457_v46 }
 0x25f   :  { %2802 = vmatprep.subr.bf16.mxu1 %v3320_v4 }
 0x262   :  { %2804 = vmatpush3.bf16.msra.mxu1 %v3461_v50 }
 0x263   :  { %2829 = vmatprep.subr.bf16.mxu1 %v3320_v4 }
 0x318   :  { %v488_v19 = vpop.f32.mrb[2].mxu1 }
 0x319   :  { %v492_v20 = vadd.f32 %v488_v19, %v217_v18  ;;  %v2153_v22 = vpop.f32.mrb[3].mxu1  ;;  %v1033_v18 = vld [vmem:[#allocation5 + $0xd0] sm:$0xff]  ;;  %v1034_v19 = vld [vmem:[#allocation5 + $0xd8] sm:$0xff] }
 0x31a   :  { %v1035_v22 = vld [vmem:[#allocation5 + $0xe0] sm:$0xff] }
 0x31b   :  { %3117 = vtanh.f32 %v492_v20  ;;  %v3654_v20 = vpack.c.bf16 %v1034_v19, %v1033_v18 }
 0x325   :  { %v3561_v23 = vpop.eup %3117 }
 0x326   :  { %2187 = vmatmul.mubr.f32.vlgmr.msra.gmra.mrb[10].mxu0 %v3561_v23 }
 0x327   :  { %2807 = vmatpush3.bf16.msra.mxu0 %v3434_v9  ;;  %2256 = vmatprep.mubr.msk.f32.mxu0 %vm3321_vm0, %v3322_v8 }
 0x328   :  { %2808 = vmatprep.subr.bf16.mxu0 %v3320_v4 }
 0x32b   :  { %2810 = vmatpush3.bf16.msra.mxu0 %v3437_v15 }
 0x32c   :  { %2811 = vmatprep.subr.bf16.mxu0 %v3320_v4 }
 0x32f   :  { %2813 = vmatpush3.bf16.msra.mxu0 %v3441_v21 }
 0x330   :  { %2814 = vmatprep.subr.bf16.mxu0 %v3320_v4 }
 0x333   :  { %2816 = vmatpush3.bf16.msra.mxu0 %v3445_v28 }
 0x334   :  { %2817 = vmatprep.subr.bf16.mxu0 %v3320_v4 }
 0x337   :  { %2819 = vmatpush3.bf16.msra.mxu0 %v3449_v34 }
 0x338   :  { %2820 = vmatprep.subr.bf16.mxu0 %v3320_v4 }
 0x33b   :  { %2822 = vmatpush3.bf16.msra.mxu0 %v3453_v40 }
 0x33c   :  { %2823 = vmatprep.subr.bf16.mxu0 %v3320_v4 }
 0x33f   :  { %2825 = vmatpush3.bf16.msra.mxu0 %v3457_v46 }
 0x340   :  { %2826 = vmatprep.subr.bf16.mxu0 %v3320_v4 }
 0x343   :  { %2828 = vmatpush3.bf16.msra.mxu0 %v3461_v50 }
 0x344   :  { %2853 = vmatprep.subr.bf16.mxu0 %v3320_v4 }
 0x3f9   :  { %v564_v25 = vpop.f32.mrb[10].mxu0 }
 0x3fa   :  { %v568_v26 = vadd.f32 %v564_v25, %v222_v24  ;;  %v2188_v27 = vpop.f32.mrb[11].mxu0  ;;  %v1037_v25 = vld [vmem:[#allocation5 + $0xf0] sm:$0xff] }
 0x3fc   :  { %3119 = vtanh.f32 %v568_v26  ;;  %v1038_v26 = vld [vmem:[#allocation5 + $0xf8] sm:$0xff] }
 0x3fd   :  { %v3662_v27 = vpack.c.bf16 %v1038_v26, %v1037_v25 }
 0x406   :  { %v3583_v29 = vpop.eup %3119 }
 0x407   :  { %2222 = vmatmul.mubr.f32.vlgmr.msra.gmra.mrb[4].mxu1 %v3583_v29 }
 0x408   :  { %2831 = vmatpush3.bf16.msra.mxu1 %v3434_v9  ;;  %2291 = vmatprep.mubr.msk.f32.mxu1 %vm3321_vm0, %v3322_v8 }
 0x409   :  { %2832 = vmatprep.subr.bf16.mxu1 %v3320_v4 }
 0x40c   :  { %2834 = vmatpush3.bf16.msra.mxu1 %v3437_v15 }
 0x40d   :  { %2835 = vmatprep.subr.bf16.mxu1 %v3320_v4 }
 0x410   :  { %2837 = vmatpush3.bf16.msra.mxu1 %v3441_v21 }
 0x411   :  { %2838 = vmatprep.subr.bf16.mxu1 %v3320_v4 }
 0x414   :  { %2840 = vmatpush3.bf16.msra.mxu1 %v3445_v28 }
 0x415   :  { %2841 = vmatprep.subr.bf16.mxu1 %v3320_v4 }
 0x418   :  { %2843 = vmatpush3.bf16.msra.mxu1 %v3449_v34 }
 0x419   :  { %2844 = vmatprep.subr.bf16.mxu1 %v3320_v4 }
 0x41c   :  { %2846 = vmatpush3.bf16.msra.mxu1 %v3453_v40 }
 0x41d   :  { %2847 = vmatprep.subr.bf16.mxu1 %v3320_v4 }
 0x420   :  { %2849 = vmatpush3.bf16.msra.mxu1 %v3457_v46 }
 0x421   :  { %2850 = vmatprep.subr.bf16.mxu1 %v3320_v4 }
 0x424   :  { %2852 = vmatpush3.bf16.msra.mxu1 %v3461_v50 }
 0x4da   :  { %v640_v31 = vpop.f32.mrb[4].mxu1 }
 0x4db   :  { %v644_v32 = vadd.f32 %v640_v31, %v227_v30  ;;  %v2223_v33 = vpop.f32.mrb[5].mxu1 }
 0x4dd   :  { %3121 = vtanh.f32 %v644_v32 }
 0x4e7   :  { %v3605_v35 = vpop.eup %3121 }
 0x4e8   :  { %2257 = vmatmul.mubr.f32.vlgmr.msra.gmra.mrb[12].mxu0 %v3605_v35 }
 0x4e9   :  { %2855 = vmatpush3.bf16.msra.mxu0 %v3434_v9  ;;  %2326 = vmatprep.mubr.msk.f32.mxu0 %vm3321_vm0, %v3322_v8  ;;  %v885_v9 = vld [vmem:[#allocation7] sm:$0xff] }
 0x4ea   :  { %2856 = vmatprep.subr.bf16.mxu0 %v3320_v4 }
 0x4ed   :  { %2858 = vmatpush3.bf16.msra.mxu0 %v3437_v15  ;;  %v886_v15 = vld [vmem:[#allocation7 + $0x8] sm:$0xff] }
 0x4ee   :  { %2859 = vmatprep.subr.bf16.mxu0 %v3320_v4 }
 0x4f1   :  { %2861 = vmatpush3.bf16.msra.mxu0 %v3441_v21  ;;  %v2877_v21 = vpack.c.bf16 %v886_v15, %v885_v9 }
 0x4f2   :  { %2862 = vmatprep.subr.bf16.mxu0 %v3320_v4 }
 0x4f3   :  { %2878 = vmatprep.subr.bf16.mxu1 %v2877_v21 }
 0x4f5   :  { %2864 = vmatpush3.bf16.msra.mxu0 %v3445_v28  ;;  %v232_v28 = vadd.f32 %v3530_v6, %v3506_v59  ;;  %v3642_v6 = vpack.c.bf16 %v1028_v5, %v1027_v3 }
 0x4f6   :  { %2865 = vmatprep.subr.bf16.mxu0 %v3320_v4 }
 0x4f9   :  { %2867 = vmatpush3.bf16.msra.mxu0 %v3449_v34 }
 0x4fa   :  { %2868 = vmatprep.subr.bf16.mxu0 %v3320_v4 }
 0x4fd   :  { %2870 = vmatpush3.bf16.msra.mxu0 %v3453_v40  ;;  %v2881_v40 = vpack.c.bf16 %v888_v39, %v887_v38 }
 0x4fe   :  { %2871 = vmatprep.subr.bf16.mxu0 %v3320_v4 }
 0x501   :  { %2873 = vmatpush3.bf16.msra.mxu0 %v3457_v46  ;;  %v892_v46 = vld [vmem:[#allocation7 + $0x38] sm:$0xff] }
 0x502   :  { %2874 = vmatprep.subr.bf16.mxu0 %v3320_v4  ;;  %v2889_v47 = vpack.c.bf16 %v892_v46, %v891_v45 }
 0x505   :  { %2876 = vmatpush3.bf16.msra.mxu0 %v3461_v50  ;;  %v2893_v50 = vpack.c.bf16 %v894_v49, %v893_v48 }
 0x506   :  { %2909 = vmatprep.subr.bf16.mxu0 %v3320_v4 }
 0x5bb   :  { %v716_v34 = vpop.f32.mrb[12].mxu0 }
 0x5bc   :  { %v720_v36 = vadd.f32 %v716_v34, %v232_v28  ;;  %v2258_v37 = vpop.f32.mrb[13].mxu0  ;;  %v106_v34 = vld [vmem:[#allocation11 + $0x8] sm:$0xff] }
 0x5be   :  { %3123 = vtanh.f32 %v720_v36  ;;  %v242_v36 = vadd.f32 %v3534_v10, %v3506_v59 }
 0x5c8   :  { %v3124_v41 = vpop.eup %3123 }
 0x5c9   :  { %2292 = vmatmul.mubr.f32.vlgmr.msra.gmra.mrb[6].mxu1 %v3124_v41 }
 0x5ca   :  { %2880 = vmatpush3.bf16.msra.mxu1 %v2877_v21  ;;  %2361 = vmatprep.mubr.f32.mxu1 %v3509_v2  ;;  %v3638_v2 = vpack.c.bf16 %v1026_v1, %v1025_v0 }
 0x5cb   :  { %2882 = vmatprep.subr.bf16.mxu1 %v2881_v40 }
 0x5ce   :  { %2884 = vmatpush3.bf16.msra.mxu1 %v2881_v40 }
 0x5cf   :  { %2886 = vmatprep.subr.bf16.mxu1 %v2885_v44 }
 0x5d2   :  { %2888 = vmatpush3.bf16.msra.mxu1 %v2885_v44 }
 0x5d3   :  { %2890 = vmatprep.subr.bf16.mxu1 %v2889_v47 }
 0x5d6   :  { %2892 = vmatpush3.bf16.msra.mxu1 %v2889_v47 }
 0x5d7   :  { %2894 = vmatprep.subr.bf16.mxu1 %v2893_v50 }
 0x5da   :  { %2896 = vmatpush3.bf16.msra.mxu1 %v2893_v50 }
 0x5db   :  { %2898 = vmatprep.subr.bf16.mxu1 %v2897_v53 }
 0x5de   :  { %2900 = vmatpush3.bf16.msra.mxu1 %v2897_v53 }
 0x5df   :  { %2902 = vmatprep.subr.bf16.mxu1 %v2901_v56 }
 0x5e2   :  { %2904 = vmatpush3.bf16.msra.mxu1 %v2901_v56 }
 0x5e3   :  { %2906 = vmatprep.subr.bf16.mxu1 %v2905_v60 }
 0x5e6   :  { %2908 = vmatpush3.bf16.msra.mxu1 %v2905_v60 }
 0x5e7   :  { %2933 = vmatprep.subr.bf16.mxu1 %v3320_v4 }
 0x5e9   :  { %2362 = vmatmul.mubr.f32.vlgmr.msra.gmra.mrb[8].mxu1 %v3539_v17  ;;  %v3650_v17 = vpack.c.bf16 %v1032_v16, %v1031_v14 }
 0x5ea   :  { %2364 = vmatprep.mubr.f32.mxu1 %v3561_v23  ;;  %2935 = vmatpush3.bf16.msra.mxu1 %v3634_v63  ;;  %v1036_v23 = vld [vmem:[#allocation5 + $0xe8] sm:$0xff] }
 0x5eb   :  { %2936 = vmatprep.subr.bf16.mxu1 %v3320_v4  ;;  %v3658_v24 = vpack.c.bf16 %v1036_v23, %v1035_v22 }
 0x5ed   :  { %2365 = vmatmul.mubr.f32.gmra.mrb[10].mxu1 %v3583_v29  ;;  %v237_v29 = vadd.f32 %v3506_v59, %v3536_v11 }
 0x5ee   :  { %2367 = vmatprep.mubr.f32.mxu1 %v3605_v35  ;;  %2938 = vmatpush3.bf16.msra.mxu1 %v3638_v2 }
 0x5ef   :  { %2939 = vmatprep.subr.bf16.mxu1 %v3320_v4 }
 0x5f1   :  { %2368 = vmatmul.mubr.f32.gmra.mrb[12].mxu1 %v3124_v41  ;;  %v3721_v41 = vld [vmem:[%s3869_s2 + $0x1] ss:$0 sm:$0xff]  ;;  %s3323_s2 = smov [#allocation13]  }
 0x5f2   :  { %2941 = vmatpush3.bf16.msra.mxu1 %v3642_v6  ;;  %s1653_s18 = sshll.u32 %s3323_s2, 4  ;;  %s1654_s18 = int_to_ptr.vmem [resolvable:$true] %s1653_s18 }
 0x5f3   :  { %2942 = vmatprep.subr.bf16.mxu1 %v3320_v4  ;;  %s3255_s21 = scalar_lea.vmem %s1654_s18, 1024  ;;  %p3260_p13 = scmp.lt.s32.totalorder %s1654_s18, %s1654_s18 }
 0x5f4   :  { %p3256_p12 = scmp.ne.s32.totalorder %s1654_s18, %s3255_s21  ;;  %p3261_p0 = scmp.lt.s32.totalorder %s3255_s21, %s3255_s21 }
 0x5f6   :  { %2944 = vmatpush3.bf16.msra.mxu1 %v3646_v13  ;;  %p3262_p1 = por %p3261_p0, %p3260_p13 }
 0x5f7   :  { %2945 = vmatprep.subr.bf16.mxu1 %v3320_v4 }
 0x5f8   :  { %p3263_p2 = pnand %p3262_p1, %p3256_p12 }
 0x5fa   :  { %2947 = vmatpush3.bf16.msra.mxu1 %v3650_v17 }
 0x5fb   :  { %2948 = vmatprep.subr.bf16.mxu1 %v3320_v4 }
 0x5fe   :  { %2950 = vmatpush3.bf16.msra.mxu1 %v3654_v20 }
 0x5ff   :  { %2951 = vmatprep.subr.bf16.mxu1 %v3320_v4 }
 0x602   :  { %2953 = vmatpush3.bf16.msra.mxu1 %v3658_v24 }
 0x603   :  { %2954 = vmatprep.subr.bf16.mxu1 %v3320_v4 }
 0x606   :  { %2956 = vmatpush3.bf16.msra.mxu1 %v3662_v27 }
 0x607   :  { %2981 = vmatprep.subr.bf16.mxu1 %v3320_v4 }
 0x69c   :  { %v792_v30 = vpop.f32.mrb[6].mxu1 }
 0x69d   :  { %v796_v31 = vadd.f32 %v792_v30, %v237_v29  ;;  %v2293_v32 = vpop.f32.mrb[7].mxu1 }
 0x69f   :  { %3125 = vtanh.f32 %v796_v31 }
 0x6a9   :  { %v3126_v33 = vpop.eup %3125 }
 0x6aa   :  { %2327 = vmatmul.mubr.f32.vlgmr.msra.gmra.mrb[14].mxu0 %v3126_v33  ;;  %2370 = vmatprep.mubr.f32.mxu1 %v3126_v33 }
 0x6ab   :  { %2911 = vmatpush3.bf16.msra.mxu0 %v3634_v63  ;;  %2405 = vmatprep.mubr.msk.f32.mxu0 %vm3321_vm0, %v3322_v8 }
 0x6ac   :  { %2912 = vmatprep.subr.bf16.mxu0 %v3320_v4 }
 0x6af   :  { %2914 = vmatpush3.bf16.msra.mxu0 %v3638_v2 }
 0x6b0   :  { %2915 = vmatprep.subr.bf16.mxu0 %v3320_v4 }
 0x6b3   :  { %2917 = vmatpush3.bf16.msra.mxu0 %v3642_v6 }
 0x6b4   :  { %2918 = vmatprep.subr.bf16.mxu0 %v3320_v4 }
 0x6b7   :  { %2920 = vmatpush3.bf16.msra.mxu0 %v3646_v13 }
 0x6b8   :  { %2921 = vmatprep.subr.bf16.mxu0 %v3320_v4 }
 0x6bb   :  { %2923 = vmatpush3.bf16.msra.mxu0 %v3650_v17 }
 0x6bc   :  { %v3679_v11 = vpop.f32.mrb[8].mxu1  ;;  %2924 = vmatprep.subr.bf16.mxu0 %v3320_v4 }
 0x6bd   :  { %v975_v35 = vpop.f32.mrb[9].mxu1  ;;  %v981_v47 = vadd.f32 %v3679_v11, %v3721_v41 }
 0x6be   :  { %v976_v42 = vadd.f32 %v3721_v41, %v975_v35 }
 0x6bf   :  { %2926 = vmatpush3.bf16.msra.mxu0 %v3654_v20 }
 0x6c0   :  { %v3683_v9 = vpop.f32.mrb[10].mxu1  ;;  %2927 = vmatprep.subr.bf16.mxu0 %v3320_v4 }
 0x6c1   :  { %v3686_v15 = vpop.f32.mrb[11].mxu1  ;;  %v991_v57 = vadd.f32 %v3683_v9, %v3721_v41 }
 0x6c2   :  { %v986_v52 = vadd.f32 %v3721_v41, %v3686_v15 }
 0x6c3   :  { %2929 = vmatpush3.bf16.msra.mxu0 %v3658_v24 }
 0x6c4   :  { %v3689_v21 = vpop.f32.mrb[12].mxu1  ;;  %2930 = vmatprep.subr.bf16.mxu0 %v3320_v4 }
 0x6c5   :  { %v3692_v28 = vpop.f32.mrb[13].mxu1 }
 0x6c6   :  { %v996_v0 = vadd.f32 %v3721_v41, %v3692_v28 }
 0x6c7   :  { %2932 = vmatpush3.bf16.msra.mxu0 %v3662_v27 }
 0x6c8   :  { %2957 = vmatprep.subr.bf16.mxu0 %v3320_v4 }
 0x6ca   :  { %2406 = vmatmul.mubr.f32.vlgmr.msra.gmra.mrb[16].mxu0 %v106_v34 }
 0x6cb   :  { %2959 = vmatpush3.bf16.msra.mxu0 %v3634_v63  ;;  %2475 = vmatprep.mubr.msk.f32.mxu0 %vm3321_vm0, %v3322_v8 }
 0x6cc   :  { %2960 = vmatprep.subr.bf16.mxu0 %v3320_v4 }
 0x6cf   :  { %2962 = vmatpush3.bf16.msra.mxu0 %v3638_v2 }
 0x6d0   :  { %2963 = vmatprep.subr.bf16.mxu0 %v3320_v4 }
 0x6d3   :  { %2965 = vmatpush3.bf16.msra.mxu0 %v3642_v6 }
 0x6d4   :  { %2966 = vmatprep.subr.bf16.mxu0 %v3320_v4 }
 0x6d7   :  { %2968 = vmatpush3.bf16.msra.mxu0 %v3646_v13 }
 0x6d8   :  { %2969 = vmatprep.subr.bf16.mxu0 %v3320_v4 }
 0x6db   :  { %2971 = vmatpush3.bf16.msra.mxu0 %v3650_v17 }
 0x6dc   :  { %2972 = vmatprep.subr.bf16.mxu0 %v3320_v4 }
 0x6df   :  { %2974 = vmatpush3.bf16.msra.mxu0 %v3654_v20 }
 0x6e0   :  { %2975 = vmatprep.subr.bf16.mxu0 %v3320_v4 }
 0x6e3   :  { %2977 = vmatpush3.bf16.msra.mxu0 %v3658_v24 }
 0x6e4   :  { %2978 = vmatprep.subr.bf16.mxu0 %v3320_v4 }
 0x6e7   :  { %2980 = vmatpush3.bf16.msra.mxu0 %v3662_v27 }
 0x6e8   :  { %3005 = vmatprep.subr.bf16.mxu0 %v3320_v4 }
 0x77d   :  { %v868_v37 = vpop.f32.mrb[14].mxu0 }
 0x77e   :  { %v872_v38 = vadd.f32 %v868_v37, %v242_v36  ;;  %v2328_v39 = vpop.f32.mrb[15].mxu0 }
 0x780   :  { %3127 = vtanh.f32 %v872_v38 }
 0x78a   :  { %v3128_v40 = vpop.eup %3127 }
 0x78b   :  { %1646 = vst [vmem:[#allocation14] sm:$0xff] %v3128_v40  ;;  %2371 = vmatmul.mubr.f32.gmra.mrb[14].mxu1 %v3128_v40 }
 0x78c   :  { %2440 = vmatprep.mubr.msk.f32.mxu1 %vm3321_vm0, %v3322_v8 }
 0x79d   :  { %v1108_v43 = vpop.f32.mrb[16].mxu0 }
 0x79e   :  { %v1112_v44 = vadd.f32 %v1108_v43, %v976_v42  ;;  %v2407_v59 = vpop.f32.mrb[17].mxu0 }
 0x7a0   :  { %3129 = vtanh.f32 %v1112_v44 }
 0x7aa   :  { %v3130_v10 = vpop.eup %3129 }
 0x7ab   :  { %1114 = vst [vmem:[#allocation13] sm:$0xff] %v3130_v10  ;;  %2441 = vmatmul.mubr.f32.vlgmr.msra.gmra.mrb[16].mxu1 %v3130_v10 }
 0x7ac   :  { %2983 = vmatpush3.bf16.msra.mxu1 %v3634_v63  ;;  %2510 = vmatprep.mubr.msk.f32.mxu1 %vm3321_vm0, %v3322_v8 }
 0x7ad   :  { %2984 = vmatprep.subr.bf16.mxu1 %v3320_v4 }
 0x7b0   :  { %2986 = vmatpush3.bf16.msra.mxu1 %v3638_v2 }
 0x7b1   :  { %2987 = vmatprep.subr.bf16.mxu1 %v3320_v4 }
 0x7b4   :  { %2989 = vmatpush3.bf16.msra.mxu1 %v3642_v6 }
 0x7b5   :  { %2990 = vmatprep.subr.bf16.mxu1 %v3320_v4 }
 0x7b8   :  { %2992 = vmatpush3.bf16.msra.mxu1 %v3646_v13 }
 0x7b9   :  { %2993 = vmatprep.subr.bf16.mxu1 %v3320_v4 }
 0x7bc   :  { %2995 = vmatpush3.bf16.msra.mxu1 %v3650_v17 }
 0x7bd   :  { %2996 = vmatprep.subr.bf16.mxu1 %v3320_v4 }
 0x7c0   :  { %2998 = vmatpush3.bf16.msra.mxu1 %v3654_v20 }
 0x7c1   :  { %2999 = vmatprep.subr.bf16.mxu1 %v3320_v4 }
 0x7c4   :  { %3001 = vmatpush3.bf16.msra.mxu1 %v3658_v24 }
 0x7c5   :  { %3002 = vmatprep.subr.bf16.mxu1 %v3320_v4 }
 0x7c8   :  { %3004 = vmatpush3.bf16.msra.mxu1 %v3662_v27 }
 0x7c9   :  { %3029 = vmatprep.subr.bf16.mxu1 %v3320_v4 }
 0x85e   :  { %v3742_v45 = vpop.f32.mrb[14].mxu1 }
 0x85f   :  { %v3744_v46 = vpop.f32.mrb[15].mxu1  ;;  %v1011_v18 = vadd.f32 %v3742_v45, %v3721_v41 }
 0x87e   :  { %v1182_v48 = vpop.f32.mrb[16].mxu1 }
 0x87f   :  { %v1186_v49 = vadd.f32 %v1182_v48, %v981_v47  ;;  %v2442_v50 = vpop.f32.mrb[17].mxu1 }
 0x881   :  { %3131 = vtanh.f32 %v1186_v49 }
 0x88b   :  { %v3132_v51 = vpop.eup %3131 }
 0x88c   :  { %1189 = vst [vmem:[#allocation13 + $0x8] sm:$0xff] %v3132_v51  ;;  %2476 = vmatmul.mubr.f32.vlgmr.msra.gmra.mrb[18].mxu0 %v3132_v51 }
 0x88d   :  { %3007 = vmatpush3.bf16.msra.mxu0 %v3634_v63  ;;  %2545 = vmatprep.mubr.msk.f32.mxu0 %vm3321_vm0, %v3322_v8 }
 0x88e   :  { %3008 = vmatprep.subr.bf16.mxu0 %v3320_v4 }
 0x891   :  { %3010 = vmatpush3.bf16.msra.mxu0 %v3638_v2 }
 0x892   :  { %3011 = vmatprep.subr.bf16.mxu0 %v3320_v4 }
 0x895   :  { %3013 = vmatpush3.bf16.msra.mxu0 %v3642_v6 }
 0x896   :  { %3014 = vmatprep.subr.bf16.mxu0 %v3320_v4 }
 0x899   :  { %3016 = vmatpush3.bf16.msra.mxu0 %v3646_v13 }
 0x89a   :  { %3017 = vmatprep.subr.bf16.mxu0 %v3320_v4 }
 0x89d   :  { %3019 = vmatpush3.bf16.msra.mxu0 %v3650_v17 }
 0x89e   :  { %3020 = vmatprep.subr.bf16.mxu0 %v3320_v4 }
 0x8a1   :  { %3022 = vmatpush3.bf16.msra.mxu0 %v3654_v20 }
 0x8a2   :  { %3023 = vmatprep.subr.bf16.mxu0 %v3320_v4 }
 0x8a5   :  { %3025 = vmatpush3.bf16.msra.mxu0 %v3658_v24 }
 0x8a6   :  { %3026 = vmatprep.subr.bf16.mxu0 %v3320_v4 }
 0x8a9   :  { %3028 = vmatpush3.bf16.msra.mxu0 %v3662_v27 }
 0x8aa   :  { %3053 = vmatprep.subr.bf16.mxu0 %v3320_v4 }
 0x95f   :  { %v1257_v53 = vpop.f32.mrb[18].mxu0 }
 0x960   :  { %v1261_v54 = vadd.f32 %v1257_v53, %v986_v52  ;;  %v2477_v55 = vpop.f32.mrb[19].mxu0 }
 0x962   :  { %3133 = vtanh.f32 %v1261_v54 }
 0x96c   :  { %v3134_v56 = vpop.eup %3133 }
 0x96d   :  { %1264 = vst [vmem:[#allocation13 + $0x10] sm:$0xff] %v3134_v56  ;;  %2511 = vmatmul.mubr.f32.vlgmr.msra.gmra.mrb[18].mxu1 %v3134_v56 }
 0x96e   :  { %3031 = vmatpush3.bf16.msra.mxu1 %v3634_v63  ;;  %2580 = vmatprep.mubr.msk.f32.mxu1 %vm3321_vm0, %v3322_v8 }
 0x96f   :  { %3032 = vmatprep.subr.bf16.mxu1 %v3320_v4 }
 0x972   :  { %3034 = vmatpush3.bf16.msra.mxu1 %v3638_v2 }
 0x973   :  { %3035 = vmatprep.subr.bf16.mxu1 %v3320_v4 }
 0x976   :  { %3037 = vmatpush3.bf16.msra.mxu1 %v3642_v6 }
 0x977   :  { %3038 = vmatprep.subr.bf16.mxu1 %v3320_v4 }
 0x97a   :  { %3040 = vmatpush3.bf16.msra.mxu1 %v3646_v13 }
 0x97b   :  { %3041 = vmatprep.subr.bf16.mxu1 %v3320_v4 }
 0x97e   :  { %3043 = vmatpush3.bf16.msra.mxu1 %v3650_v17 }
 0x97f   :  { %3044 = vmatprep.subr.bf16.mxu1 %v3320_v4 }
 0x982   :  { %3046 = vmatpush3.bf16.msra.mxu1 %v3654_v20 }
 0x983   :  { %3047 = vmatprep.subr.bf16.mxu1 %v3320_v4 }
 0x986   :  { %3049 = vmatpush3.bf16.msra.mxu1 %v3658_v24 }
 0x987   :  { %3050 = vmatprep.subr.bf16.mxu1 %v3320_v4 }
 0x98a   :  { %3052 = vmatpush3.bf16.msra.mxu1 %v3662_v27 }
 0x98b   :  { %3077 = vmatprep.subr.bf16.mxu1 %v3320_v4 }
 0xa40   :  { %v1332_v58 = vpop.f32.mrb[18].mxu1 }
 0xa41   :  { %v1336_v60 = vadd.f32 %v1332_v58, %v991_v57  ;;  %v2512_v61 = vpop.f32.mrb[19].mxu1 }
 0xa43   :  { %3135 = vtanh.f32 %v1336_v60 }
 0xa4d   :  { %v3136_v62 = vpop.eup %3135 }
 0xa4e   :  { %1339 = vst [vmem:[#allocation13 + $0x18] sm:$0xff] %v3136_v62  ;;  %2546 = vmatmul.mubr.f32.vlgmr.msra.gmra.mrb[20].mxu0 %v3136_v62 }
 0xa4f   :  { %3055 = vmatpush3.bf16.msra.mxu0 %v3634_v63  ;;  %2615 = vmatprep.mubr.msk.f32.mxu0 %vm3321_vm0, %v3322_v8 }
 0xa50   :  { %3056 = vmatprep.subr.bf16.mxu0 %v3320_v4 }
 0xa53   :  { %3058 = vmatpush3.bf16.msra.mxu0 %v3638_v2 }
 0xa54   :  { %3059 = vmatprep.subr.bf16.mxu0 %v3320_v4 }
 0xa57   :  { %3061 = vmatpush3.bf16.msra.mxu0 %v3642_v6 }
 0xa58   :  { %3062 = vmatprep.subr.bf16.mxu0 %v3320_v4 }
 0xa5b   :  { %3064 = vmatpush3.bf16.msra.mxu0 %v3646_v13 }
 0xa5c   :  { %3065 = vmatprep.subr.bf16.mxu0 %v3320_v4 }
 0xa5f   :  { %3067 = vmatpush3.bf16.msra.mxu0 %v3650_v17 }
 0xa60   :  { %3068 = vmatprep.subr.bf16.mxu0 %v3320_v4 }
 0xa63   :  { %3070 = vmatpush3.bf16.msra.mxu0 %v3654_v20 }
 0xa64   :  { %3071 = vmatprep.subr.bf16.mxu0 %v3320_v4 }
 0xa67   :  { %3073 = vmatpush3.bf16.msra.mxu0 %v3658_v24 }
 0xa68   :  { %3074 = vmatprep.subr.bf16.mxu0 %v3320_v4 }
 0xa6b   :  { %3076 = vmatpush3.bf16.msra.mxu0 %v3662_v27 }
 0xb21   :  { %v1407_v1 = vpop.f32.mrb[20].mxu0 }
 0xb22   :  { %v1411_v3 = vadd.f32 %v1407_v1, %v996_v0  ;;  %v2547_v5 = vpop.f32.mrb[21].mxu0 }
 0xb24   :  { %3137 = vtanh.f32 %v1411_v3 }
 0xb2e   :  { %v3138_v7 = vpop.eup %3137 }
 0xb2f   :  { %1414 = vst [vmem:[#allocation13 + $0x20] sm:$0xff] %v3138_v7  ;;  %2581 = vmatmul.mubr.f32.vlgmr.msra.gmra.mrb[20].mxu1 %v3138_v7 }
 0xb30   :  { %3079 = vmatpush3.bf16.msra.mxu1 %v3634_v63  ;;  %2650 = vmatprep.mubr.msk.f32.mxu1 %vm3321_vm0, %v3322_v8  ;;  %v1001_v8 = vadd.f32 %v3689_v21, %v3721_v41 }
 0xb31   :  { %3080 = vmatprep.subr.bf16.mxu1 %v3320_v4 }
 0xb34   :  { %3082 = vmatpush3.bf16.msra.mxu1 %v3638_v2 }
 0xb35   :  { %3083 = vmatprep.subr.bf16.mxu1 %v3320_v4 }
 0xb38   :  { %3085 = vmatpush3.bf16.msra.mxu1 %v3642_v6 }
 0xb39   :  { %3086 = vmatprep.subr.bf16.mxu1 %v3320_v4 }
 0xb3c   :  { %3088 = vmatpush3.bf16.msra.mxu1 %v3646_v13  ;;  %v1006_v13 = vadd.f32 %v3721_v41, %v3744_v46 }
 0xb3d   :  { %3089 = vmatprep.subr.bf16.mxu1 %v3320_v4 }
 0xb40   :  { %3091 = vmatpush3.bf16.msra.mxu1 %v3650_v17 }
 0xb41   :  { %3092 = vmatprep.subr.bf16.mxu1 %v3320_v4 }
 0xb44   :  { %3094 = vmatpush3.bf16.msra.mxu1 %v3654_v20 }
 0xb45   :  { %3095 = vmatprep.subr.bf16.mxu1 %v3320_v4 }
 0xb48   :  { %3097 = vmatpush3.bf16.msra.mxu1 %v3658_v24 }
 0xb49   :  { %3098 = vmatprep.subr.bf16.mxu1 %v3320_v4 }
 0xb4c   :  { %3100 = vmatpush3.bf16.msra.mxu1 %v3662_v27 }
 0xc02   :  { %v1482_v63 = vpop.f32.mrb[20].mxu1 }
 0xc03   :  { %v1486_v2 = vadd.f32 %v1482_v63, %v1001_v8  ;;  %v2582_v6 = vpop.f32.mrb[21].mxu1 }
 0xc05   :  { %3139 = vtanh.f32 %v1486_v2 }
 0xc0f   :  { %v3140_v12 = vpop.eup %3139 }
 0xc10   :  { %1489 = vst [vmem:[#allocation13 + $0x28] sm:$0xff] %v3140_v12  ;;  %2616 = vmatmul.mubr.f32.vlgmr.msra.gmra.mrb[22].mxu0 %v3140_v12 }
 0xce3   :  { %v1557_v14 = vpop.f32.mrb[22].mxu0 }
 0xce4   :  { %v1561_v16 = vadd.f32 %v1557_v14, %v1006_v13  ;;  %v2617_v17 = vpop.f32.mrb[23].mxu0 }
 0xce6   :  { %3141 = vtanh.f32 %v1561_v16 }
 0xcf0   :  { %v3142_v4 = vpop.eup %3141 }
 0xcf1   :  { %1564 = vst [vmem:[#allocation13 + $0x30] sm:$0xff] %v3142_v4  ;;  %2651 = vmatmul.mubr.f32.vlgmr.msra.gmra.mrb[22].mxu1 %v3142_v4 }
 0xdc4   :  { %v1632_v19 = vpop.f32.mrb[22].mxu1 }
 0xdc5   :  { %v1636_v20 = vadd.f32 %v1632_v19, %v1011_v18  ;;  %v2652_v22 = vpop.f32.mrb[23].mxu1 }
 0xdc7   :  { %3143 = vtanh.f32 %v1636_v20 }
 0xdd1   :  { %v3144_v23 = vpop.eup %3143 }
 0xdd2   :  { %1639 = vst [vmem:[#allocation13 + $0x38] sm:$0xff] %v3144_v23  ;;  %1647 = vst [vmem:[#allocation14 + $0x8] sm:$0xff] %v3144_v23 }
 0xdd3   :  { %3266 = shalt.err (!%p3263_p2)
}
 0xdd4   :  { %s3267_s24 = scalar_lea.hbm %s3873_s6, 1024 }
 0xdd5   :  { %p3268_p3 = scmp.ne.s32.totalorder %s3873_s6, %s3267_s24  ;;  %p3271_p4 = scmp.lt.u32.totalorder %s3267_s24, %s3873_s6 }
 0xdd7   :  { %p3273_p5 = pnand %p3271_p4, %p3268_p3 }
 0xdd9   :  { %3276 = shalt.err (!%p3273_p5)
}
 0xdda   :  { %1659 = dma.vmem_to_hbm [thread:$0]  %s1654_s18, 1024, %s3873_s6, [#allocation10], %s3314_s11, %s3314_s11, %s3315_s12  }
 0xddb   :  { %s3277_s29 = scalar_lea.vmem %s3830_s20, 256  ;;  %p3282_p7 = scmp.lt.s32.totalorder %s3830_s20, %s3830_s20 }
 0xddc   :  { %p3278_p6 = scmp.ne.s32.totalorder %s3830_s20, %s3277_s29  ;;  %p3283_p8 = scmp.lt.s32.totalorder %s3277_s29, %s3277_s29 }
 0xdde   :  { %p3284_p9 = por %p3283_p8, %p3282_p7 }
 0xde0   :  { %p3285_p10 = pnand %p3284_p9, %p3278_p6 }
 0xde2   :  { %3288 = shalt.err (!%p3285_p10)
}
 0xde3   :  { %s3289_s9 = scalar_lea.hbm %s3874_s7, 256 }
 0xde4   :  { %p3290_p11 = scmp.ne.s32.totalorder %s3874_s7, %s3289_s9  ;;  %p3293_p12 = scmp.lt.u32.totalorder %s3289_s9, %s3874_s7 }
 0xde6   :  { %p3295_p13 = pnand %p3293_p12, %p3290_p11 }
 0xde8   :  { %3298 = shalt.err (!%p3295_p13)
}
 0xde9   :  { %1671 = dma.vmem_to_hbm [thread:$0]  %s3830_s20, 256, %s3874_s7, [#allocation15], %s3314_s11, %s3314_s11, %s3315_s12  }
 0xdea   :  { %3309 = dma.done.wait [#allocation10], 1024  }
 0xdeb   :  { %3310 = vsyncadd [#allocation10], 4294966272 }
 0xdec   :  { %3311 = dma.done.wait [#allocation15], 256  }
 0xded   :  { %3312 = vsyncadd [#allocation15], 4294967040 }
 0xdee   :  { %1678 = vsyncpa [#allocation9], 1 }
 0xdef   :  { %1679 = vsyncpa [#allocation12], 1 }
 0xdf0   :  { %1680 = vsyncpa [#allocation10], 1 }
 0xdf1   :  { %1681 = vsyncpa [#allocation15], 1 }

</bundles_post_ra>
